<compile_context>
chip_gen: v5e
topology: v5e:2x2
jax: 0.10.0
libtpu: 0.0.40
codegen_flags: <defaults>
</compile_context>

<pallas_src>
from functools import partial

import jax
import jax.numpy as jnp
import numpy as np
from jax.experimental import pallas as pl
from jax.experimental.pallas import tpu as pltpu

_LANE = 128


def _round_up(n, m):
    return ((n + m - 1) // m) * m


def _vmem_limit_bytes():
    """~3/4 of physical VMEM: 96 MiB on v5e/v6e (128 MiB), 48 MiB on v7x (64 MiB)."""
    cap = 64 * 1024 * 1024
    try:
        info = pltpu.get_tpu_info()
        cap = int(getattr(info, "vmem_capacity_bytes", cap))
    except Exception:
        pass
    return int(min(cap * 3 // 4, 100 * 1024 * 1024))


# ----------------------------------------------------------------------------
# Pallas kernels (grid = (batch, row-tile); one NHWC image per batch step)
# ----------------------------------------------------------------------------
def _conv_kernel(x_ref, w_ref, b_ref, o_ref, xpad_ref, *, K, pad, row_tile):
    """Same-padding KxK conv, stride 1, K*K accumulated MXU dots (f32 acc).

    x_ref   : (1, H, W, Cin)       f32   full image, index constant over row tiles
    w_ref   : (K*K, Cin, CoutP)    bf16  taps in (kh, kw) order, CoutP lane-padded
    b_ref   : (1, CoutP)           f32
    o_ref   : (1, TH*W, Cout)      f32   row-tile of the (B, H*W, Cout) output
    xpad_ref: (H+2p, W+2p, Cin)    bf16  VMEM scratch: in-kernel halo pad + cast
    """
    _, H, W, Cin = x_ref.shape
    CoutP = w_ref.shape[-1]
    cout = o_ref.shape[-1]
    TH = row_tile
    t = pl.program_id(1)

    # In-kernel halo pad + bf16 cast (replaces a separate XLA pad pass over HBM).
    xpad_ref[...] = jnp.zeros_like(xpad_ref)
    xpad_ref[pad:pad + H, pad:pad + W, :] = x_ref[0].astype(xpad_ref.dtype)

    row0 = pl.multiple_of(t * TH, TH)
    acc = jnp.zeros((TH * W, CoutP), jnp.float32)
    for kh in range(K):                           # static, unrolled taps
        for kw in range(K):
            tap = xpad_ref[pl.ds(row0 + kh, TH), kw:kw + W, :]
            tap = tap.reshape(TH * W, Cin)
            acc = acc + jnp.dot(tap, w_ref[kh * K + kw],
                                preferred_element_type=jnp.float32)
    acc = acc + b_ref[...]                        # (TH*W, CoutP) + (1, CoutP)
    # Store only the real Cout channels: no post-kernel slice pass, minimal HBM.
    o_ref[0] = acc[:, :cout].astype(o_ref.dtype)


def _avgpool_kernel(x_ref, o_ref, xpad_ref, *, K, pad, row_tile):
    """Same-padding KxK average pool, stride 1, count_include_pad=True.

    Separable f32 sums: H pass first (leading-axis slices, pure addressing),
    then the W pass.  Halo pad done in VMEM scratch (no wrapper pad pass).
    x_ref: (1, H, W, C)   o_ref: (1, TH, W, C)   xpad_ref: (H+2p, W+2p, C) f32
    """
    _, H, W, C = x_ref.shape
    TH = row_tile
    t = pl.program_id(1)

    xpad_ref[...] = jnp.zeros_like(xpad_ref)
    xpad_ref[pad:pad + H, pad:pad + W, :] = x_ref[0].astype(xpad_ref.dtype)

    row0 = pl.multiple_of(t * TH, TH)
    acc = xpad_ref[pl.ds(row0, TH), :, :]
    for kh in range(1, K):                        # H pass (addressing only)
        acc = acc + xpad_ref[pl.ds(row0 + kh, TH), :, :]
    out = acc[:, 0:W, :]
    for kw in range(1, K):                        # W pass (sublane shifts)
        out = out + acc[:, kw:kw + W, :]
    o_ref[0] = (out * (1.0 / (K * K))).astype(o_ref.dtype)


# ----------------------------------------------------------------------------
# Candidate-op wrappers (NHWC in / NHWC out)
# ----------------------------------------------------------------------------
def make_conv_op(kernel_size, cin, cout, seed, row_tile=8):
    # 'same' padding via K//2 is only correct for odd kernel sizes.
    assert kernel_size % 2 == 1, "conv candidate requires an odd kernel size"
    K = kernel_size
    pad = K // 2

    k1, k2 = jax.random.split(jax.random.PRNGKey(seed))
    w = jax.random.normal(k1, (K, K, cin, cout), jnp.float32) * (
        1.0 / np.sqrt(K * K * cin))
    b = jax.random.normal(k2, (cout,), jnp.float32) * 0.01

    # One-time weight prep: pad Cout to a lane multiple (dense MXU N), cast bf16.
    cout_p = _round_up(cout, _LANE)
    w_k = jnp.pad(w, ((0, 0), (0, 0), (0, 0), (0, cout_p - cout)))
    w_k = w_k.reshape(K * K, cin, cout_p).astype(jnp.bfloat16)
    b_k = jnp.pad(b, (0, cout_p - cout)).reshape(1, cout_p)
    vmem_limit = _vmem_limit_bytes()

    def _impl(x_nhwc):
        B, H, W, Cin = x_nhwc.shape
        assert Cin == cin
        TH = row_tile if H % row_tile == 0 else H
        nT = H // TH
        Hp, Wp = H + 2 * pad, W + 2 * pad

        flops = 2 * B * H * W * K * K * cin * cout_p
        bytes_accessed = (B * H * W * cin * 4 + B * H * W * cout * 4
                          + K * K * cin * cout_p * 2 + cout_p * 4)

        y = pl.pallas_call(
            partial(_conv_kernel, K=K, pad=pad, row_tile=TH),
            out_shape=jax.ShapeDtypeStruct((B, H * W, cout), jnp.float32),
            grid=(B, nT),
            in_specs=[
                # Full image; index constant over the row-tile axis -> Pallas
                # skips the redundant re-fetch across consecutive row tiles.
                pl.BlockSpec((1, H, W, cin), lambda bi, ti: (bi, 0, 0, 0)),
                pl.BlockSpec((K * K, cin, cout_p), lambda bi, ti: (0, 0, 0)),
                pl.BlockSpec((1, cout_p), lambda bi, ti: (0, 0)),
            ],
            out_specs=pl.BlockSpec((1, TH * W, cout), lambda bi, ti: (bi, ti, 0)),
            scratch_shapes=[pltpu.VMEM((Hp, Wp, cin), jnp.bfloat16)],
            compiler_params=pltpu.CompilerParams(
                dimension_semantics=("parallel", "parallel"),
                vmem_limit_bytes=vmem_limit),
            cost_estimate=pl.CostEstimate(
                flops=flops, transcendentals=0, bytes_accessed=bytes_accessed),
        )(x_nhwc, w_k, b_k)
        return y.reshape(B, H, W, cout)          # free, contiguous

    conv_jit = jax.jit(_impl)

    def op(x_nhwc):
        return conv_jit(x_nhwc)

    op.params = (w, b)                           # plain function attr (safe)
    return op


def make_avgpool_op(kernel_size, row_tile=8):
    assert kernel_size % 2 == 1, "avg-pool candidate requires an odd kernel size"
    K = kernel_size
    pad = K // 2
    vmem_limit = _vmem_limit_bytes()

    def _impl(x_nhwc):
        B, H, W, C = x_nhwc.shape
        TH = row_tile if H % row_tile == 0 else H
        nT = H // TH
        Hp, Wp = H + 2 * pad, W + 2 * pad
        return pl.pallas_call(
            partial(_avgpool_kernel, K=K, pad=pad, row_tile=TH),
            out_shape=jax.ShapeDtypeStruct((B, H, W, C), x_nhwc.dtype),
            grid=(B, nT),
            in_specs=[pl.BlockSpec((1, H, W, C), lambda bi, ti: (bi, 0, 0, 0))],
            out_specs=pl.BlockSpec((1, TH, W, C), lambda bi, ti: (bi, ti, 0, 0)),
            scratch_shapes=[pltpu.VMEM((Hp, Wp, C), jnp.float32)],
            compiler_params=pltpu.CompilerParams(
                dimension_semantics=("parallel", "parallel"),
                vmem_limit_bytes=vmem_limit),
        )(x_nhwc)

    pool_jit = jax.jit(_impl)

    def op(x_nhwc):
        return pool_jit(x_nhwc)

    return op


def make_identity_op():
    # No kernel on purpose: the identity candidate is a no-op; a Pallas copy
    # would only add HBM traffic for zero compute.
    def op(x_nhwc):
        return x_nhwc
    return op


# ----------------------------------------------------------------------------
# MixedOp: faithful port of the PyTorch module's control flow
# ----------------------------------------------------------------------------
class MixedOp:
    def __init__(self, key, ops):
        self._key = key
        self._value = None
        self._pruned = False
        self.ops = ops                      # list or dict of callables
        self.num_op_candidates = len(ops)

    @property
    def key(self):
        return self._key

    @property
    def activated(self):
        return self._value

    def activate(self, value):
        self._value = value

    @property
    def op_candidates(self):
        if self._pruned:
            return self._op_candidates
        if isinstance(self.ops, dict):
            return list(self.ops.keys())
        return list(range(len(self.ops)))

    def searchspace(self):
        return {self._key: self.op_candidates}

    def prune(self):
        self._op_candidates = self.op_candidates
        assert self._value is not None
        self.ops = self.ops[self._value]
        self._pruned = True

    def execute(self, *args, **kwargs):
        if self._pruned:
            return self.ops(*args, **kwargs)
        return self.ops[self.activated](*args, **kwargs)

    def forward(self, *args, **kwargs):
        return self.execute(*args, **kwargs)

    __call__ = forward


# ----------------------------------------------------------------------------
# Reference implementations (plain JAX, NHWC) for sanity checking
# ----------------------------------------------------------------------------
def _ref_conv_nhwc(x, w_hwio, b, pad):
    y = jax.lax.conv_general_dilated(
        x, w_hwio, window_strides=(1, 1),
        padding=((pad, pad), (pad, pad)),
        dimension_numbers=("NHWC", "HWIO", "NHWC"),
        precision=jax.lax.Precision.HIGHEST)
    return y + b.reshape(1, 1, 1, -1)


def _ref_avgpool_nhwc(x, k):
    pad = k // 2
    s = jax.lax.reduce_window(
        x, 0.0, jax.lax.add, (1, k, k, 1), (1, 1, 1, 1),
        ((0, 0), (pad, pad), (pad, pad), (0, 0)))
    return s / (k * k)


if __name__ == "__main__":
    B, H, W, C = 2, 16, 16, 4
    x = jax.random.normal(jax.random.PRNGKey(0), (B, H, W, C), jnp.float32)

    conv3 = make_conv_op(3, C, C, seed=1)
    conv1 = make_conv_op(1, C, C, seed=2)
    pool3 = make_avgpool_op(3)
    ident = make_identity_op()

    mixed = MixedOp("cell0_op", [conv3, conv1, pool3, ident])

    # References use the same bf16-quantized matmul inputs as the kernel,
    # so differences are only accumulation-order noise.
    x_q = x.astype(jnp.bfloat16).astype(jnp.float32)

    # exercise every candidate through the MixedOp dispatch path
    mixed.activate(0)
    y0 = jax.block_until_ready(mixed(x))
    w3, b3 = conv3.params
    ref0 = _ref_conv_nhwc(x_q, w3.astype(jnp.bfloat16).astype(jnp.float32), b3, pad=1)
    np.testing.assert_allclose(np.asarray(y0), np.asarray(ref0), rtol=1e-3, atol=1e-3)

    mixed.activate(1)
    y1 = jax.block_until_ready(mixed(x))
    w1, b1 = conv1.params
    ref1 = _ref_conv_nhwc(x_q, w1.astype(jnp.bfloat16).astype(jnp.float32), b1, pad=0)
    np.testing.assert_allclose(np.asarray(y1), np.asarray(ref1), rtol=1e-3, atol=1e-3)

    mixed.activate(2)
    y2 = jax.block_until_ready(mixed(x))
    np.testing.assert_allclose(np.asarray(y2), np.asarray(_ref_avgpool_nhwc(x, 3)),
                               rtol=1e-5, atol=1e-5)

    mixed.activate(3)
    y3 = jax.block_until_ready(mixed(x))
    np.testing.assert_allclose(np.asarray(y3), np.asarray(x), rtol=0, atol=0)

    # prune down to the selected op and run the pruned path
    mixed.activate(0)
    mixed.prune()
    yp = jax.block_until_ready(mixed(x))
    np.testing.assert_allclose(np.asarray(yp), np.asarray(y0), rtol=0, atol=0)

    assert y0.shape == (B, H, W, C)
    print("KERNEL_OK")
</pallas_src>

<mosaic_0001>
module attributes {stable_mosaic.version = 11 : i64} {
  func.func @_conv_kernel(%arg0: i32, %arg1: i32, %arg2: memref<1x16x16x4xf32, #tpu.memory_space<vmem>>, %arg3: memref<9x4x128xbf16, #tpu.memory_space<vmem>>, %arg4: memref<1x128xf32, #tpu.memory_space<vmem>>, %arg5: memref<1x128x4xf32, #tpu.memory_space<vmem>>, %arg6: memref<18x18x4xbf16, #tpu.memory_space<vmem>>) attributes {dimension_semantics = [#tpu.dimension_semantics<parallel>, #tpu.dimension_semantics<parallel>], iteration_bounds = array<i64: 2, 2>, scalar_prefetch = 0 : i64, scratch_operands = 1 : i64, tpu.core_type = #tpu.core_type<tc>, window_params = [{transform_indices = @transform_0, window_bounds = array<i64: 1, 16, 16, 4>}, {pipeline_mode = #tpu.pipeline_mode<synchronous>, transform_indices = @transform_1, window_bounds = array<i64: 9, 4, 128>}, {pipeline_mode = #tpu.pipeline_mode<synchronous>, transform_indices = @transform_2, window_bounds = array<i64: 1, 128>}, {transform_indices = @transform_3, window_bounds = array<i64: 1, 128, 4>}]} {
    %cst = arith.constant 0.000000e+00 : bf16
    %0 = vector.broadcast %cst : bf16 to vector<18x18x4xbf16>
    %c0 = arith.constant 0 : index
    %c0_0 = arith.constant 0 : index
    %c0_1 = arith.constant 0 : index
    %1 = vector.load %arg6[%c0, %c0_0, %c0_1] : memref<18x18x4xbf16, #tpu.memory_space<vmem>>, vector<18x18x4xbf16>
    tpu.vector_store %arg6[%c0, %c0_0, %c0_1], %0 {strides = array<i32>} : memref<18x18x4xbf16, #tpu.memory_space<vmem>>, vector<18x18x4xbf16>,
    %c0_2 = arith.constant 0 : index
    %c0_3 = arith.constant 0 : index
    %c0_4 = arith.constant 0 : index
    %c0_5 = arith.constant 0 : index
    %2 = vector.load %arg2[%c0_2, %c0_3, %c0_4, %c0_5] : memref<1x16x16x4xf32, #tpu.memory_space<vmem>>, vector<1x16x16x4xf32>
    %3 = vector.shape_cast %2 : vector<1x16x16x4xf32> to vector<16x16x4xf32>
    %4 = arith.truncf %3 : vector<16x16x4xf32> to vector<16x16x4xbf16>
    %c1 = arith.constant 1 : index
    %c1_6 = arith.constant 1 : index
    %c0_7 = arith.constant 0 : index
    %5 = vector.load %arg6[%c1, %c1_6, %c0_7] : memref<18x18x4xbf16, #tpu.memory_space<vmem>>, vector<16x16x4xbf16>
    tpu.vector_store %arg6[%c1, %c1_6, %c0_7], %4 {strides = array<i32>} : memref<18x18x4xbf16, #tpu.memory_space<vmem>>, vector<16x16x4xbf16>,
    %c8_i32 = arith.constant 8 : i32
    %6 = arith.muli %arg1, %c8_i32 : i32
    %7 = tpu.assume_multiple %6, 8 : i32
    %cst_8 = arith.constant 0.000000e+00 : f32
    %8 = vector.broadcast %cst_8 : f32 to vector<128x128xf32>
    %c0_i32 = arith.constant 0 : i32
    %9 = arith.addi %7, %c0_i32 : i32
    %10 = arith.index_cast %9 : i32 to index
    %c0_9 = arith.constant 0 : index
    %c0_10 = arith.constant 0 : index
    %11 = vector.load %arg6[%10, %c0_9, %c0_10] : memref<18x18x4xbf16, #tpu.memory_space<vmem>>, vector<8x16x4xbf16>
    %12 = vector.shape_cast %11 : vector<8x16x4xbf16> to vector<128x4xbf16>
    %c0_11 = arith.constant 0 : index
    %c0_12 = arith.constant 0 : index
    %c0_13 = arith.constant 0 : index
    %13 = vector.load %arg3[%c0_11, %c0_12, %c0_13] : memref<9x4x128xbf16, #tpu.memory_space<vmem>>, vector<1x4x128xbf16>
    %14 = vector.shape_cast %13 : vector<1x4x128xbf16> to vector<4x128xbf16>
    %cst_14 = arith.constant dense<0.000000e+00> : vector<128x128xf32>
    %15 = tpu.matmul %12, %14, %cst_14 {dimension_numbers = #tpu.dot_dimension_numbers<[1], [0], [0], [1], [0, 0, 1, 1], [], []>} : vector<128x4xbf16>, vector<4x128xbf16>, vector<128x128xf32> -> vector<128x128xf32>
    %16 = arith.addf %8, %15 : vector<128x128xf32>
    %c0_i32_15 = arith.constant 0 : i32
    %17 = arith.addi %7, %c0_i32_15 : i32
    %18 = arith.index_cast %17 : i32 to index
    %c1_16 = arith.constant 1 : index
    %c0_17 = arith.constant 0 : index
    %19 = vector.load %arg6[%18, %c1_16, %c0_17] : memref<18x18x4xbf16, #tpu.memory_space<vmem>>, vector<8x16x4xbf16>
    %20 = vector.shape_cast %19 : vector<8x16x4xbf16> to vector<128x4xbf16>
    %c1_18 = arith.constant 1 : index
    %c0_19 = arith.constant 0 : index
    %c0_20 = arith.constant 0 : index
    %21 = vector.load %arg3[%c1_18, %c0_19, %c0_20] : memref<9x4x128xbf16, #tpu.memory_space<vmem>>, vector<1x4x128xbf16>
    %22 = vector.shape_cast %21 : vector<1x4x128xbf16> to vector<4x128xbf16>
    %cst_21 = arith.constant dense<0.000000e+00> : vector<128x128xf32>
    %23 = tpu.matmul %20, %22, %cst_21 {dimension_numbers = #tpu.dot_dimension_numbers<[1], [0], [0], [1], [0, 0, 1, 1], [], []>} : vector<128x4xbf16>, vector<4x128xbf16>, vector<128x128xf32> -> vector<128x128xf32>
    %24 = arith.addf %16, %23 : vector<128x128xf32>
    %c0_i32_22 = arith.constant 0 : i32
    %25 = arith.addi %7, %c0_i32_22 : i32
    %26 = arith.index_cast %25 : i32 to index
    %c2 = arith.constant 2 : index
    %c0_23 = arith.constant 0 : index
    %27 = vector.load %arg6[%26, %c2, %c0_23] : memref<18x18x4xbf16, #tpu.memory_space<vmem>>, vector<8x16x4xbf16>
    %28 = vector.shape_cast %27 : vector<8x16x4xbf16> to vector<128x4xbf16>
    %c2_24 = arith.constant 2 : index
    %c0_25 = arith.constant 0 : index
    %c0_26 = arith.constant 0 : index
    %29 = vector.load %arg3[%c2_24, %c0_25, %c0_26] : memref<9x4x128xbf16, #tpu.memory_space<vmem>>, vector<1x4x128xbf16>
    %30 = vector.shape_cast %29 : vector<1x4x128xbf16> to vector<4x128xbf16>
    %cst_27 = arith.constant dense<0.000000e+00> : vector<128x128xf32>
    %31 = tpu.matmul %28, %30, %cst_27 {dimension_numbers = #tpu.dot_dimension_numbers<[1], [0], [0], [1], [0, 0, 1, 1], [], []>} : vector<128x4xbf16>, vector<4x128xbf16>, vector<128x128xf32> -> vector<128x128xf32>
    %32 = arith.addf %24, %31 : vector<128x128xf32>
    %c1_i32 = arith.constant 1 : i32
    %33 = arith.addi %7, %c1_i32 : i32
    %34 = arith.index_cast %33 : i32 to index
    %c0_28 = arith.constant 0 : index
    %c0_29 = arith.constant 0 : index
    %35 = vector.load %arg6[%34, %c0_28, %c0_29] : memref<18x18x4xbf16, #tpu.memory_space<vmem>>, vector<8x16x4xbf16>
    %36 = vector.shape_cast %35 : vector<8x16x4xbf16> to vector<128x4xbf16>
    %c3 = arith.constant 3 : index
    %c0_30 = arith.constant 0 : index
    %c0_31 = arith.constant 0 : index
    %37 = vector.load %arg3[%c3, %c0_30, %c0_31] : memref<9x4x128xbf16, #tpu.memory_space<vmem>>, vector<1x4x128xbf16>
    %38 = vector.shape_cast %37 : vector<1x4x128xbf16> to vector<4x128xbf16>
    %cst_32 = arith.constant dense<0.000000e+00> : vector<128x128xf32>
    %39 = tpu.matmul %36, %38, %cst_32 {dimension_numbers = #tpu.dot_dimension_numbers<[1], [0], [0], [1], [0, 0, 1, 1], [], []>} : vector<128x4xbf16>, vector<4x128xbf16>, vector<128x128xf32> -> vector<128x128xf32>
    %40 = arith.addf %32, %39 : vector<128x128xf32>
    %c1_i32_33 = arith.constant 1 : i32
    %41 = arith.addi %7, %c1_i32_33 : i32
    %42 = arith.index_cast %41 : i32 to index
    %c1_34 = arith.constant 1 : index
    %c0_35 = arith.constant 0 : index
    %43 = vector.load %arg6[%42, %c1_34, %c0_35] : memref<18x18x4xbf16, #tpu.memory_space<vmem>>, vector<8x16x4xbf16>
    %44 = vector.shape_cast %43 : vector<8x16x4xbf16> to vector<128x4xbf16>
    %c4 = arith.constant 4 : index
    %c0_36 = arith.constant 0 : index
    %c0_37 = arith.constant 0 : index
    %45 = vector.load %arg3[%c4, %c0_36, %c0_37] : memref<9x4x128xbf16, #tpu.memory_space<vmem>>, vector<1x4x128xbf16>
    %46 = vector.shape_cast %45 : vector<1x4x128xbf16> to vector<4x128xbf16>
    %cst_38 = arith.constant dense<0.000000e+00> : vector<128x128xf32>
    %47 = tpu.matmul %44, %46, %cst_38 {dimension_numbers = #tpu.dot_dimension_numbers<[1], [0], [0], [1], [0, 0, 1, 1], [], []>} : vector<128x4xbf16>, vector<4x128xbf16>, vector<128x128xf32> -> vector<128x128xf32>
    %48 = arith.addf %40, %47 : vector<128x128xf32>
    %c1_i32_39 = arith.constant 1 : i32
    %49 = arith.addi %7, %c1_i32_39 : i32
    %50 = arith.index_cast %49 : i32 to index
    %c2_40 = arith.constant 2 : index
    %c0_41 = arith.constant 0 : index
    %51 = vector.load %arg6[%50, %c2_40, %c0_41] : memref<18x18x4xbf16, #tpu.memory_space<vmem>>, vector<8x16x4xbf16>
    %52 = vector.shape_cast %51 : vector<8x16x4xbf16> to vector<128x4xbf16>
    %c5 = arith.constant 5 : index
    %c0_42 = arith.constant 0 : index
    %c0_43 = arith.constant 0 : index
    %53 = vector.load %arg3[%c5, %c0_42, %c0_43] : memref<9x4x128xbf16, #tpu.memory_space<vmem>>, vector<1x4x128xbf16>
    %54 = vector.shape_cast %53 : vector<1x4x128xbf16> to vector<4x128xbf16>
    %cst_44 = arith.constant dense<0.000000e+00> : vector<128x128xf32>
    %55 = tpu.matmul %52, %54, %cst_44 {dimension_numbers = #tpu.dot_dimension_numbers<[1], [0], [0], [1], [0, 0, 1, 1], [], []>} : vector<128x4xbf16>, vector<4x128xbf16>, vector<128x128xf32> -> vector<128x128xf32>
    %56 = arith.addf %48, %55 : vector<128x128xf32>
    %c2_i32 = arith.constant 2 : i32
    %57 = arith.addi %7, %c2_i32 : i32
    %58 = arith.index_cast %57 : i32 to index
    %c0_45 = arith.constant 0 : index
    %c0_46 = arith.constant 0 : index
    %59 = vector.load %arg6[%58, %c0_45, %c0_46] : memref<18x18x4xbf16, #tpu.memory_space<vmem>>, vector<8x16x4xbf16>
    %60 = vector.shape_cast %59 : vector<8x16x4xbf16> to vector<128x4xbf16>
    %c6 = arith.constant 6 : index
    %c0_47 = arith.constant 0 : index
    %c0_48 = arith.constant 0 : index
    %61 = vector.load %arg3[%c6, %c0_47, %c0_48] : memref<9x4x128xbf16, #tpu.memory_space<vmem>>, vector<1x4x128xbf16>
    %62 = vector.shape_cast %61 : vector<1x4x128xbf16> to vector<4x128xbf16>
    %cst_49 = arith.constant dense<0.000000e+00> : vector<128x128xf32>
    %63 = tpu.matmul %60, %62, %cst_49 {dimension_numbers = #tpu.dot_dimension_numbers<[1], [0], [0], [1], [0, 0, 1, 1], [], []>} : vector<128x4xbf16>, vector<4x128xbf16>, vector<128x128xf32> -> vector<128x128xf32>
    %64 = arith.addf %56, %63 : vector<128x128xf32>
    %c2_i32_50 = arith.constant 2 : i32
    %65 = arith.addi %7, %c2_i32_50 : i32
    %66 = arith.index_cast %65 : i32 to index
    %c1_51 = arith.constant 1 : index
    %c0_52 = arith.constant 0 : index
    %67 = vector.load %arg6[%66, %c1_51, %c0_52] : memref<18x18x4xbf16, #tpu.memory_space<vmem>>, vector<8x16x4xbf16>
    %68 = vector.shape_cast %67 : vector<8x16x4xbf16> to vector<128x4xbf16>
    %c7 = arith.constant 7 : index
    %c0_53 = arith.constant 0 : index
    %c0_54 = arith.constant 0 : index
    %69 = vector.load %arg3[%c7, %c0_53, %c0_54] : memref<9x4x128xbf16, #tpu.memory_space<vmem>>, vector<1x4x128xbf16>
    %70 = vector.shape_cast %69 : vector<1x4x128xbf16> to vector<4x128xbf16>
    %cst_55 = arith.constant dense<0.000000e+00> : vector<128x128xf32>
    %71 = tpu.matmul %68, %70, %cst_55 {dimension_numbers = #tpu.dot_dimension_numbers<[1], [0], [0], [1], [0, 0, 1, 1], [], []>} : vector<128x4xbf16>, vector<4x128xbf16>, vector<128x128xf32> -> vector<128x128xf32>
    %72 = arith.addf %64, %71 : vector<128x128xf32>
    %c2_i32_56 = arith.constant 2 : i32
    %73 = arith.addi %7, %c2_i32_56 : i32
    %74 = arith.index_cast %73 : i32 to index
    %c2_57 = arith.constant 2 : index
    %c0_58 = arith.constant 0 : index
    %75 = vector.load %arg6[%74, %c2_57, %c0_58] : memref<18x18x4xbf16, #tpu.memory_space<vmem>>, vector<8x16x4xbf16>
    %76 = vector.shape_cast %75 : vector<8x16x4xbf16> to vector<128x4xbf16>
    %c8 = arith.constant 8 : index
    %c0_59 = arith.constant 0 : index
    %c0_60 = arith.constant 0 : index
    %77 = vector.load %arg3[%c8, %c0_59, %c0_60] : memref<9x4x128xbf16, #tpu.memory_space<vmem>>, vector<1x4x128xbf16>
    %78 = vector.shape_cast %77 : vector<1x4x128xbf16> to vector<4x128xbf16>
    %cst_61 = arith.constant dense<0.000000e+00> : vector<128x128xf32>
    %79 = tpu.matmul %76, %78, %cst_61 {dimension_numbers = #tpu.dot_dimension_numbers<[1], [0], [0], [1], [0, 0, 1, 1], [], []>} : vector<128x4xbf16>, vector<4x128xbf16>, vector<128x128xf32> -> vector<128x128xf32>
    %80 = arith.addf %72, %79 : vector<128x128xf32>
    %c0_62 = arith.constant 0 : index
    %c0_63 = arith.constant 0 : index
    %81 = vector.load %arg4[%c0_62, %c0_63] : memref<1x128xf32, #tpu.memory_space<vmem>>, vector<1x128xf32>
    %82 = vector.broadcast %81 : vector<1x128xf32> to vector<128x128xf32>
    %83 = arith.addf %80, %82 : vector<128x128xf32>
    %84 = vector.extract_strided_slice %83 {offsets = [0, 0], sizes = [128, 4], strides = [1, 1]} : vector<128x128xf32> to vector<128x4xf32>
    %c0_64 = arith.constant 0 : index
    %c0_65 = arith.constant 0 : index
    %c0_66 = arith.constant 0 : index
    %85 = vector.load %arg5[%c0_64, %c0_65, %c0_66] : memref<1x128x4xf32, #tpu.memory_space<vmem>>, vector<1x128x4xf32>
    %86 = vector.shape_cast %85 : vector<1x128x4xf32> to vector<128x4xf32>
    %87 = vector.shape_cast %84 : vector<128x4xf32> to vector<1x128x4xf32>
    tpu.vector_store %arg5[%c0_64, %c0_65, %c0_66], %87 {strides = array<i32>} : memref<1x128x4xf32, #tpu.memory_space<vmem>>, vector<1x128x4xf32>,
    return
  }
  func.func @transform_0(%arg0: i32, %arg1: i32) -> (i32, i32, i32, i32) {
    %c0_i32 = arith.constant 0 : i32
    %c0_i32_0 = arith.constant 0 : i32
    %c0_i32_1 = arith.constant 0 : i32
    %c0_i32_2 = arith.constant 0 : i32
    return %arg0, %c0_i32, %c0_i32_0, %c0_i32_1 : i32, i32, i32, i32
  }
  func.func @transform_1(%arg0: i32, %arg1: i32) -> (i32, i32, i32) {
    %c0_i32 = arith.constant 0 : i32
    %c0_i32_0 = arith.constant 0 : i32
    %c0_i32_1 = arith.constant 0 : i32
    %c0_i32_2 = arith.constant 0 : i32
    return %c0_i32, %c0_i32_0, %c0_i32_1 : i32, i32, i32
  }
  func.func @transform_2(%arg0: i32, %arg1: i32) -> (i32, i32) {
    %c0_i32 = arith.constant 0 : i32
    %c0_i32_0 = arith.constant 0 : i32
    %c0_i32_1 = arith.constant 0 : i32
    return %c0_i32, %c0_i32_0 : i32, i32
  }
  func.func @transform_3(%arg0: i32, %arg1: i32) -> (i32, i32, i32) {
    %c0_i32 = arith.constant 0 : i32
    %c0_i32_0 = arith.constant 0 : i32
    return %arg0, %arg1, %c0_i32 : i32, i32, i32
  }
}

</mosaic_0001>

<bundles_post_ra>
// kernel: _impl.1
= control target key start
LH: loop header
LB: loop body
LE: loop exit
PB: predicated region body
PF: predicated region fallthrough
CT: control target
= control target key end

     0   :  { %s3366_s12 = smov 0   ;;  %s3368_s13 = smov 0   ;;  %s4676_s0 = inlined_call_operand.vmem [shape: f32[2,16,16,4], index: 0, kind: input, shape index: {}]   ;;  %s4677_s1 = inlined_call_operand.vmem [shape: bf16[9,4,128], index: 1, kind: input, shape index: {}]   ;;  %s4678_s2 = inlined_call_operand.vmem [shape: f32[1,128], index: 2, kind: input, shape index: {}]   ;;  %s4679_s3 = inlined_call_operand.vmem [shape: f32[2,256,4], index: 3, kind: output, shape index: {}]  }
   0x1   :  { %s3370_s14 = smov 0   ;;  %s3372_s15 = smov 0  }
   0x2   :  { %s3374_s16 = smov 0  }
   0x3 LB: > { %s22_s17 = sadd.s32 1, %s3335_s14  ;;  %s25_s18 = sadd.s32 1, %s3339_s15  ;;  %s3343_s16 = sphi %s3374_s16, %s13_s16   ;;  %s3339_s15 = sphi %s3372_s15, %s4693_s15   ;;  %s3335_s14 = sphi %s3370_s14, %s4692_s14   ;;  %s3331_s13 = sphi %s3368_s13, %s4691_s13   ;;  %s3327_s12 = sphi %s3366_s12, %s4690_s12  }
   0x4   : > { %p23_p0 = scmp.ge.s32.totalorder %s22_s17, 2  ;;  %p2923_p1 = scmp.ge.s32.totalorder %s3343_s16, 1 }
   0x5   : > { %p151_p2 = scmp.lt.s32.totalorder %s3343_s16, 5 }
   0x6   : > { %s4695_s17 = smov (%p23_p0, %s22_s17), 0  ;;  %s4697_s18 = smov (!%p23_p0, %s25_s18), %s3339_s15 }
   0x7   : > { %p152_p3 = pnand %p2923_p1, %p151_p2  ;;  %p27_p4 = scmp.ge.s32.totalorder %s4697_s18, 2 }
   0x8   : > { %p179_p5 = scmp.lt.s32.totalorder (!%p152_p3), %s3331_s13, 1  ;;  %s3235_s27 = smul.u32 (!%p152_p3), 96, %s3327_s12 }
   0x9   : > { %s4699_s18 = smov (%p27_p4, %s4697_s18), 0  ;;  %155 = sbr.rel (%p152_p3) target bundleno = 568 (0x238), region = 32 }
   0xa   : > { %s3886_s7 = scalar_lea.vmem (!%p152_p3), [#allocation2], %s3235_s27  ;;  %s2926_s23 = sshll.u32 (!%p152_p3), %s3327_s12, 4 }
   0xb   : > { %p187_p6 = scmp.lt.s32.totalorder (!%p152_p3), %s2926_s23, 31 }
   0xe   : > { %v2932_v0 = vld [vmem:[%s4677_s1 + $0x2] sm:$0x3]  ;;  %vm1031_vm0 = vcmask 1041408   ;;  %vm195_vm1 = vcmask 27648   ;;  %v3345_v2 = vmov 0   ;;  %vm198_vm2 = vcmask 24576  }
   0xf   : > { %v1033_v1 = vsel %vm1031_vm0, %v2932_v0, 0  ;;  %196 = vst.msk [vmem:[#allocation2] sm:$0xf] %vm195_vm1, %v3345_v2  ;;  %s4701_s13 = smov (!%p179_p5, %s3331_s13), 1  ;;  %vm315_vm3 = vsmask.f32 256 }
  0x10   : > { %3260 = vmatpush.bf16.msra.mxu1 %v1033_v1  ;;  %3261 = vmatpush.bf16.msra.mxu2 %v1033_v1  ;;  %197 = vst.msk [vmem:[#allocation2 + $0x4] sm:$0xf] %vm195_vm1, %v3345_v2  ;;  %s3234_s21 = sshll.u32 %s4701_s13, 8  ;;  %vm316_vm4 = vsmask.f32 4368  ;;  %vm3693_vm6 = vmand %vm198_vm2, %vm315_vm3  ;;  %vm1006_vm11 = vcmask 31744  }
  0x11   : > { %3262 = vmatpush.bf16.msra.mxu3 %v1033_v1  ;;  %1042 = vmatpush.bf16.msra.mxu0 %v1033_v1  ;;  %199 = vst.msk [vmem:[#allocation2 + $0x8] sm:$0x1] %vm198_vm2, %v3345_v2  ;;  %s3466_s24 = scalar_lea.vmem %s4676_s0, %s3234_s21  ;;  %vm3577_vm5 = vmor %vm315_vm3, %vm316_vm4  ;;  %vm640_vm7 = vsmask.f32 7938  ;;  %v3016_v60 = vld [vmem:[%s4677_s1 + $0x6] sm:$0x3] }
  0x12   : > { %200 = vst.msk [vmem:[#allocation2 + $0xc] sm:$0xf] %vm195_vm1, %v3345_v2  ;;  %v251_v3 = vld [vmem:[%s3466_s24] sm:$0xff]  ;;  %v252_v4 = vld [vmem:[%s3466_s24 + $0x8] sm:$0xff]  ;;  %v253_v5 = vld [vmem:[%s3466_s24 + $0x10] sm:$0xff]  ;;  %vm1224_vm13 = vcmask 1042432  }
  0x13   : > { %201 = vst.msk [vmem:[#allocation2 + $0x10] sm:$0xf] %vm195_vm1, %v3345_v2  ;;  %v254_v6 = vld [vmem:[%s3466_s24 + $0x18] sm:$0xff]  ;;  %v255_v7 = vld [vmem:[%s3466_s24 + $0x20] sm:$0xff]  ;;  %v256_v8 = vld [vmem:[%s3466_s24 + $0x28] sm:$0xff]  ;;  %v3488_v9 = vpack.c.bf16 %v251_v3, %v251_v3  ;;  %v284_v10 = vpack.c.bf16 %v252_v4, %v252_v4  ;;  %v3492_v11 = vpack.c.bf16 %v253_v5, %v253_v5  ;;  %vm1225_vm14 = vcmask 1046532  }
  0x14   : > { %202 = vst.msk [vmem:[#allocation2 + $0x14] sm:$0x1] %vm198_vm2, %v3345_v2  ;;  %v286_v12 = vpack.c.bf16 %v254_v6, %v254_v6  ;;  %v257_v13 = vld [vmem:[%s3466_s24 + $0x30] sm:$0xff]  ;;  %v258_v14 = vld [vmem:[%s3466_s24 + $0x38] sm:$0xff]  ;;  %v3500_v15 = vpack.c.bf16 %v255_v7, %v255_v7  ;;  %v288_v16 = vpack.c.bf16 %v256_v8, %v256_v8  ;;  %v259_v17 = vld [vmem:[%s3466_s24 + $0x40] sm:$0xff]  ;;  %s4703_s23 = smov (!%p187_p6, %s2926_s23), 31 }
  0x15   : > { %203 = vst.msk [vmem:[#allocation2 + $0x18] sm:$0xf] %vm195_vm1, %v3345_v2  ;;  %v319_v18 = vshrl.u32 %v3488_v9, 16  ;;  %v327_v19 = vshrl.u32 %v284_v10, 16  ;;  %v260_v20 = vld [vmem:[%s3466_s24 + $0x48] sm:$0xff]  ;;  %v261_v21 = vld [vmem:[%s3466_s24 + $0x50] sm:$0xff]  ;;  %v3514_v24 = vpack.c.bf16 %v257_v13, %v257_v13  ;;  %v3516_v25 = vpack.c.bf16 %v258_v14, %v258_v14  ;;  %vm3714_vm8 = vmand %vm195_vm1, %vm640_vm7 }
  0x16   : > { %204 = vst.msk [vmem:[#allocation2 + $0x1c] sm:$0xf] %vm195_vm1, %v3345_v2  ;;  %v336_v22 = vshrl.u32 %v3492_v11, 16  ;;  %v262_v23 = vld [vmem:[%s3466_s24 + $0x58] sm:$0xff]  ;;  %v344_v26 = vshrl.u32 %v286_v12, 16  ;;  %v263_v27 = vld [vmem:[%s3466_s24 + $0x60] sm:$0xff]  ;;  %v3521_v28 = vpack.c.bf16 %v259_v17, %v259_v17  ;;  %v292_v33 = vpack.c.bf16 %v260_v20, %v260_v20  ;;  %vm4022_vm15 = vmor %vm1224_vm13, %vm1225_vm14 }
  0x17   : > { %205 = vst.msk [vmem:[#allocation2 + $0x20] sm:$0x1] %vm198_vm2, %v3345_v2  ;;  %v353_v29 = vshrl.u32 %v3500_v15, 16  ;;  %v361_v30 = vshrl.u32 %v288_v16, 16  ;;  %v264_v31 = vld [vmem:[%s3466_s24 + $0x68] sm:$0xff]  ;;  %v265_v32 = vld [vmem:[%s3466_s24 + $0x70] sm:$0xff]  ;;  %v3528_v34 = vpack.c.bf16 %v261_v21, %v261_v21  ;;  %v3536_v37 = vpack.c.bf16 %v262_v23, %v262_v23 }
  0x18   : > { %206 = vst.msk [vmem:[#allocation2 + $0x24] sm:$0xf] %vm195_vm1, %v3345_v2  ;;  %v3530_v35 = vrot.slane %v319_v18, 7  ;;  %v3532_v36 = vrot.slane %v327_v19, 7  ;;  %v330_v38 = vshll.u32 %v284_v10, 16  ;;  %v3538_v39 = vrot.slane %v336_v22, 7 }
  0x19   : > { %207 = vst.msk [vmem:[#allocation2 + $0x28] sm:$0xf] %vm195_vm1, %v3345_v2  ;;  %v3542_v40 = vrot.slane %v344_v26, 7  ;;  %v347_v41 = vshll.u32 %v286_v12, 16  ;;  %v370_v42 = vshrl.u32 %v3514_v24, 16  ;;  %v378_v43 = vshrl.u32 %v3516_v25, 16 }
  0x1a   : > { %208 = vst.msk [vmem:[#allocation2 + $0x2c] sm:$0x1] %vm198_vm2, %v3345_v2  ;;  %v3548_v44 = vpack.c.bf16 %v263_v27, %v263_v27  ;;  %v3550_v45 = vrot.slane %v353_v29, 7  ;;  %v3552_v46 = vrot.slane %v361_v30, 7  ;;  %v364_v47 = vshll.u32 %v288_v16, 16  ;;  %v266_v51 = vld [vmem:[%s3466_s24 + $0x78] sm:$0xff] }
  0x1b   : > { %209 = vst.msk [vmem:[#allocation2 + $0x30] sm:$0xf] %vm195_vm1, %v3345_v2  ;;  %v296_v48 = vpack.c.bf16 %v264_v31, %v264_v31  ;;  %v387_v49 = vshrl.u32 %v3521_v28, 16  ;;  %v395_v50 = vshrl.u32 %v292_v33, 16  ;;  %v3560_v52 = vpack.c.bf16 %v265_v32, %v265_v32  ;;  %v267_v30 = vld [vmem:[%s3466_s24 + $0x80] sm:$0xff] }
  0x1c   : > { %210 = vst.msk [vmem:[#allocation2 + $0x34] sm:$0xf] %vm195_vm1, %v3345_v2  ;;  %v325_v53 = vrot.slane %v3530_v35, 4  ;;  %v332_v54 = vor.u32 %v330_v38, %v3532_v36  ;;  %v342_v55 = vrot.slane %v3538_v39, 4  ;;  %v349_v56 = vor.u32 %v347_v41, %v3542_v40  ;;  %v268_v38 = vld [vmem:[%s3466_s24 + $0x88] sm:$0xff] }
  0x1d   : > { %211 = vst.msk [vmem:[#allocation2 + $0x38] sm:$0x1] %vm198_vm2, %v3345_v2  ;;  %v3568_v57 = vrot.slane %v370_v42, 7  ;;  %v3570_v58 = vrot.slane %v378_v43, 7  ;;  %v381_v59 = vshll.u32 %v3516_v25, 16  ;;  %v359_v61 = vrot.slane %v3550_v45, 4 }
  0x1e   : > { %212 = vst.msk [vmem:[#allocation2 + $0x3c] sm:$0xf] %vm195_vm1, %v3345_v2  ;;  %v366_v62 = vor.u32 %v364_v47, %v3552_v46  ;;  %v404_v63 = vshrl.u32 %v3528_v34, 16  ;;  %v412_v0 = vshrl.u32 %v3536_v37, 16  ;;  %v298_v1 = vpack.c.bf16 %v266_v51, %v266_v51  ;;  %v269_v43 = vld [vmem:[%s3466_s24 + $0x90] sm:$0xff]  ;;  %v270_v47 = vld [vmem:[%s3466_s24 + $0x98] sm:$0xff] }
  0x1f   : > { %213 = vst.msk [vmem:[#allocation2 + $0x40] sm:$0xf] %vm195_vm1, %v3345_v2  ;;  %v3587_v3 = vrot.slane %v387_v49, 7  ;;  %v3589_v4 = vrot.slane %v395_v50, 7  ;;  %v398_v5 = vshll.u32 %v292_v33, 16  ;;  %v421_v6 = vshrl.u32 %v3548_v44, 16 }
  0x20   : > { %214 = vst.msk [vmem:[#allocation2 + $0x44] sm:$0x1] %vm198_vm2, %v3345_v2  ;;  %v429_v7 = vshrl.u32 %v296_v48, 16  ;;  %v333_v8 = vsel %vm3577_vm5, %v325_v53, %v332_v54  ;;  %v350_v10 = vsel %vm3577_vm5, %v342_v55, %v349_v56  ;;  %v376_v12 = vrot.slane %v3568_v57, 4  ;;  %v272_v50 = vld [vmem:[%s3466_s24 + $0xa8] sm:$0xff]  ;;  %v273_v51 = vld [vmem:[%s3466_s24 + $0xb0] sm:$0xff] }
  0x21   : > { %215 = vst.msk [vmem:[#allocation2 + $0x48] sm:$0xf] %vm195_vm1, %v3345_v2  ;;  %v383_v13 = vor.u32 %v381_v59, %v3570_v58  ;;  %v367_v14 = vsel %vm3577_vm5, %v359_v61, %v366_v62  ;;  %v3606_v16 = vrot.slane %v404_v63, 7  ;;  %v3608_v17 = vrot.slane %v412_v0, 7  ;;  %v274_v53 = vld [vmem:[%s3466_s24 + $0xb8] sm:$0xff]  ;;  %v275_v56 = vld [vmem:[%s3466_s24 + $0xc0] sm:$0xff] }
  0x22   : > { %216 = vst.msk [vmem:[#allocation2 + $0x4c] sm:$0xf] %vm195_vm1, %v3345_v2  ;;  %v415_v18 = vshll.u32 %v3536_v37, 16  ;;  %v393_v19 = vrot.slane %v3587_v3, 4  ;;  %v400_v20 = vor.u32 %v398_v5, %v3589_v4  ;;  %v438_v21 = vshrl.u32 %v3560_v52, 16 }
  0x23   : > { %217 = vst.msk [vmem:[#allocation2 + $0x50] sm:$0x1] %vm198_vm2, %v3345_v2  ;;  %v446_v22 = vshrl.u32 %v298_v1, 16  ;;  %v3616_v23 = vrot.slane %v421_v6, 7  ;;  %v3618_v25 = vrot.slane %v429_v7, 7  ;;  %v432_v26 = vshll.u32 %v296_v48, 16 }
  0x24   : > { %218 = vst.msk [vmem:[#allocation2 + $0x54] sm:$0xf] %vm195_vm1, %v3345_v2  ;;  %v410_v27 = vrot.slane %v3606_v16, 4  ;;  %v417_v29 = vor.u32 %v415_v18, %v3608_v17  ;;  %v401_v31 = vsel %vm3577_vm5, %v393_v19, %v400_v20  ;;  %v3630_v32 = vrot.slane %v438_v21, 7  ;;  %v271_v48 = vld [vmem:[%s3466_s24 + $0xa0] sm:$0xff]  ;;  %v278_v20 = vld [vmem:[%s3466_s24 + $0xd8] sm:$0xff] }
  0x25   : > { %219 = vst.msk [vmem:[#allocation2 + $0x58] sm:$0xf] %vm195_vm1, %v3345_v2  ;;  %v3632_v33 = vrot.slane %v446_v22, 7  ;;  %v449_v37 = vshll.u32 %v298_v1, 16  ;;  %v427_v41 = vrot.slane %v3616_v23, 4  ;;  %v434_v42 = vor.u32 %v432_v26, %v3618_v25  ;;  %v279_v21 = vld [vmem:[%s3466_s24 + $0xe0] sm:$0xff] }
  0x26   : > { %220 = vst.msk [vmem:[#allocation2 + $0x5c] sm:$0x1] %vm198_vm2, %v3345_v2  ;;  %v322_v49 = vshll.u32 %v3488_v9, 16  ;;  %v3645_v54 = vpack.c.bf16 %v267_v30, %v267_v30  ;;  %v418_v55 = vsel %vm3577_vm5, %v410_v27, %v417_v29  ;;  %v3651_v59 = vpack.c.bf16 %v268_v38, %v268_v38  ;;  %v642_v30 = vld [vmem:[#allocation2 + $0xc] sm:$0xf] }
  0x27   : > { %221 = vst.msk [vmem:[#allocation2 + $0x60] sm:$0xf] %vm195_vm1, %v3345_v2  ;;  %v339_v61 = vshll.u32 %v3492_v11, 16  ;;  %v444_v62 = vrot.slane %v3630_v32, 4  ;;  %v451_v9 = vor.u32 %v449_v37, %v3632_v33  ;;  %v3656_v63 = vpack.c.bf16 %v269_v43, %v269_v43  ;;  %v655_v38 = vld [vmem:[#allocation2 + $0x20] sm:$0x1] }
  0x28   : > { %222 = vst.msk [vmem:[#allocation2 + $0x64] sm:$0xf] %vm195_vm1, %v3345_v2  ;;  %v3658_v0 = vpack.c.bf16 %v270_v47, %v270_v47  ;;  %v3660_v1 = vpack.c.bf16 %v271_v48, %v271_v48  ;;  %v435_v5 = vsel %vm3577_vm5, %v427_v41, %v434_v42  ;;  %v3664_v6 = vpack.c.bf16 %v272_v50, %v272_v50  ;;  %v280_v41 = vld [vmem:[%s3466_s24 + $0xe8] sm:$0xff]  ;;  %v658_v48 = vld [vmem:[#allocation2 + $0x24] sm:$0xf] }
  0x29   : > { %223 = vst.msk [vmem:[#allocation2 + $0x68] sm:$0x1] %vm198_vm2, %v3345_v2  ;;  %v3666_v7 = vpack.c.bf16 %v273_v51, %v273_v51  ;;  %v3668_v11 = vpack.c.bf16 %v274_v53, %v274_v53  ;;  %v356_v18 = vshll.u32 %v3500_v15, 16  ;;  %v373_v19 = vshll.u32 %v3514_v24, 16  ;;  %v281_v53 = vld [vmem:[%s3466_s24 + $0xf0] sm:$0xff] }
  0x2a   : > { %224 = vst.msk [vmem:[#allocation2 + $0x6c] sm:$0xf] %vm195_vm1, %v3345_v2  ;;  %v341_v22 = vor.u32 %v339_v61, %v3538_v39  ;;  %v351_v26 = vrot.slane %v3542_v40, 4  ;;  %v385_v27 = vrot.slane %v3570_v58, 4  ;;  %v407_v15 = vshll.u32 %v3528_v34, 16 }
  0x2b   : > { %225 = vst.msk [vmem:[#allocation2 + $0x70] sm:$0xf] %vm195_vm1, %v3345_v2  ;;  %v424_v24 = vshll.u32 %v3548_v44, 16  ;;  %v648_v40 = vld [vmem:[#allocation2 + $0x14] sm:$0x1]  ;;  %v402_v58 = vrot.slane %v3589_v4, 4  ;;  %v3705_v44 = vpack.c.bf16 %v279_v21, %v279_v21  ;;  %v358_v37 = vor.u32 %v356_v18, %v3550_v45 }
  0x2c   : > { %226 = vst.msk [vmem:[#allocation2 + $0x74] sm:$0x1] %vm198_vm2, %v3345_v2  ;;  %v651_v34 = vld [vmem:[#allocation2 + $0x18] sm:$0xf]  ;;  %v375_v42 = vor.u32 %v373_v19, %v3568_v57  ;;  %v419_v4 = vrot.slane %v3608_v17, 4  ;;  %v441_v43 = vshll.u32 %v3560_v52, 16  ;;  %v3744_v21 = vpack.c.bf16 %v280_v41, %v280_v41 }
  0x2d   : > { %227 = vst.msk [vmem:[#allocation2 + $0x78] sm:$0xf] %vm195_vm1, %v3345_v2  ;;  %v436_v50 = vrot.slane %v3618_v25, 4  ;;  %v458_v51 = vshll.u32 %v3645_v54, 16  ;;  %v652_v52 = vsel %vm3714_vm8, %v341_v22, %v651_v34  ;;  %v665_v17 = vld [vmem:[#allocation2 + $0x30] sm:$0xf] }
  0x2e   : > { %228 = vst.msk [vmem:[#allocation2 + $0x7c] sm:$0xf] %vm195_vm1, %v3345_v2  ;;  %v463_v61 = vshrl.u32 %v3651_v59, 16  ;;  %v466_v18 = vshll.u32 %v3651_v59, 16  ;;  %v666_v19 = vsel %vm3714_vm8, %v375_v42, %v665_v17  ;;  %v475_v22 = vshll.u32 %v3656_v63, 16 }
  0x2f   : > { %229 = vst.msk [vmem:[#allocation2 + $0x80] sm:$0x1] %vm198_vm2, %v3345_v2  ;;  %v506_v42 = vshrl.u32 %v3666_v7, 16  ;;  %v776_v39 = vld [vmem:[%s4677_s1] sm:$0x3] }
  0x30   : > { %230 = vst.msk [vmem:[#allocation2 + $0x84] sm:$0xf] %vm195_vm1, %v3345_v2  ;;  %v3081_v47 = vld [vmem:[%s4677_s1 + $0x8] sm:$0x3]  ;;  %vm785_vm9 = vsmask.f32 3328 }
  0x31   : > { %231 = vst.msk [vmem:[#allocation2 + $0x88] sm:$0xf] %vm195_vm1, %v3345_v2  ;;  %vm786_vm10 = vsmask.f32 7440 }
  0x32   : > { %232 = vst.msk [vmem:[#allocation2 + $0x8c] sm:$0x1] %vm198_vm2, %v3345_v2  ;;  %vm3914_vm12 = vmor %vm785_vm9, %vm786_vm10 }
  0x33   : > { %233 = vst.msk [vmem:[#allocation2 + $0x90] sm:$0xf] %vm195_vm1, %v3345_v2 }
  0x34   : > { %234 = vst.msk [vmem:[#allocation2 + $0x94] sm:$0xf] %vm195_vm1, %v3345_v2 }
  0x35   : > { %235 = vst.msk [vmem:[#allocation2 + $0x98] sm:$0x1] %vm198_vm2, %v3345_v2 }
  0x36   : > { %236 = vst.msk [vmem:[#allocation2 + $0x9c] sm:$0xf] %vm195_vm1, %v3345_v2 }
  0x37   : > { %237 = vst.msk [vmem:[#allocation2 + $0xa0] sm:$0xf] %vm195_vm1, %v3345_v2 }
  0x38   : > { %238 = vst.msk [vmem:[#allocation2 + $0xa4] sm:$0x1] %vm198_vm2, %v3345_v2 }
  0x39   : > { %239 = vst.msk [vmem:[#allocation2 + $0xa8] sm:$0xf] %vm195_vm1, %v3345_v2 }
  0x3a   : > { %240 = vst.msk [vmem:[#allocation2 + $0xac] sm:$0xf] %vm195_vm1, %v3345_v2 }
  0x3b   : > { %241 = vst.msk [vmem:[#allocation2 + $0xb0] sm:$0x1] %vm198_vm2, %v3345_v2 }
  0x3c   : > { %242 = vst.msk [vmem:[#allocation2 + $0xb4] sm:$0xf] %vm195_vm1, %v3345_v2 }
  0x3d   : > { %243 = vst.msk [vmem:[#allocation2 + $0xb8] sm:$0xf] %vm195_vm1, %v3345_v2 }
  0x3e   : > { %244 = vst.msk [vmem:[#allocation2 + $0xbc] sm:$0x1] %vm198_vm2, %v3345_v2 }
  0x3f   : > { %245 = vst.msk [vmem:[#allocation2 + $0xc0] sm:$0xf] %vm195_vm1, %v3345_v2 }
  0x40   : > { %246 = vst.msk [vmem:[#allocation2 + $0xc4] sm:$0xf] %vm195_vm1, %v3345_v2 }
  0x41   : > { %247 = vst.msk [vmem:[#allocation2 + $0xc8] sm:$0x1] %vm198_vm2, %v3345_v2 }
  0x42   : > { %248 = vst.msk [vmem:[#allocation2 + $0xcc] sm:$0xf] %vm195_vm1, %v3345_v2 }
  0x43   : > { %249 = vst.msk [vmem:[#allocation2 + $0xd0] sm:$0xf] %vm195_vm1, %v3345_v2 }
  0x44   : > { %250 = vst.msk [vmem:[#allocation2 + $0xd4] sm:$0x1] %vm198_vm2, %v3345_v2  ;;  %v384_v2 = vsel %vm3577_vm5, %v376_v12, %v383_v13  ;;  %v277_v12 = vld [vmem:[%s3466_s24 + $0xd0] sm:$0xff]  ;;  %v3674_v13 = vpack.c.bf16 %v275_v56, %v275_v56 }
  0x45   : > { %645 = vst.msk [vmem:[#allocation2 + $0x10] sm:$0xf] %vm195_vm1, %v333_v8  ;;  %v324_v8 = vor.u32 %v322_v49, %v3530_v35  ;;  %v368_v35 = vrot.slane %v3552_v46, 4  ;;  %v3699_v29 = vpack.c.bf16 %v277_v12, %v277_v12  ;;  %v662_v49 = vld [vmem:[#allocation2 + $0x2c] sm:$0x1]  ;;  %v409_v12 = vor.u32 %v407_v15, %v3606_v16 }
  0x46   : > { %654 = vst.msk [vmem:[#allocation2 + $0x1c] sm:$0xf] %vm195_vm1, %v350_v10  ;;  %v276_v10 = vld [vmem:[%s3466_s24 + $0xc8] sm:$0xff]  ;;  %v683_v15 = vld [vmem:[#allocation2 + $0x50] sm:$0x1] }
  0x47   : > { %661 = vst.msk [vmem:[#allocation2 + $0x28] sm:$0xf] %vm195_vm1, %v367_v14  ;;  %v334_v14 = vrot.slane %v3532_v36, 4  ;;  %v390_v36 = vshll.u32 %v3521_v28, 16  ;;  %v3697_v46 = vpack.c.bf16 %v276_v10, %v276_v10  ;;  %v455_v28 = vshrl.u32 %v3645_v54, 16 }
  0x48   : > { %668 = vst.msk [vmem:[#allocation2 + $0x34] sm:$0xf] %vm195_vm1, %v384_v2  ;;  %v452_v2 = vsel %vm3577_vm5, %v444_v62, %v451_v9  ;;  %v643_v57 = vsel %vm3714_vm8, %v324_v8, %v642_v30  ;;  %v656_v62 = vsel %vm3693_vm6, %v351_v26, %v655_v38  ;;  %v669_v54 = vld [vmem:[#allocation2 + $0x38] sm:$0x1]  ;;  %v472_v9 = vshrl.u32 %v3656_v63, 16 }
  0x49   : > { %675 = vst.msk [vmem:[#allocation2 + $0x40] sm:$0xf] %vm195_vm1, %v401_v31  ;;  %v3703_v31 = vpack.c.bf16 %v278_v20, %v278_v20  ;;  %v649_v45 = vsel %vm3693_vm6, %v334_v14, %v648_v40  ;;  %v3728_v56 = vrot.slane %v455_v28, 7  ;;  %v659_v8 = vsel %vm3714_vm8, %v358_v37, %v658_v48  ;;  %v672_v10 = vld [vmem:[#allocation2 + $0x3c] sm:$0xf] }
  0x4a   : > { %682 = vst.msk [vmem:[#allocation2 + $0x4c] sm:$0xf] %vm195_vm1, %v418_v55  ;;  %v392_v55 = vor.u32 %v390_v36, %v3587_v3  ;;  %v663_v3 = vsel %vm3693_vm6, %v368_v35, %v662_v49  ;;  %v453_v14 = vrot.slane %v3632_v33, 4  ;;  %v676_v20 = vld [vmem:[#allocation2 + $0x44] sm:$0x1]  ;;  %v483_v26 = vshll.u32 %v3658_v0, 16 }
  0x4b   : > { %689 = vst.msk [vmem:[#allocation2 + $0x58] sm:$0xf] %vm195_vm1, %v435_v5  ;;  %v480_v5 = vshrl.u32 %v3658_v0, 16  ;;  %v670_v35 = vsel %vm3693_vm6, %v385_v27, %v669_v54  ;;  %v679_v16 = vld [vmem:[#allocation2 + $0x48] sm:$0xf]  ;;  %v426_v33 = vor.u32 %v424_v24, %v3616_v23  ;;  %v461_v59 = vrot.slane %v3728_v56, 4 }
  0x4c   : > { %696 = vst.msk [vmem:[#allocation2 + $0x64] sm:$0xf] %vm195_vm1, %v452_v2  ;;  %v3752_v2 = vrot.slane %v463_v61, 7  ;;  %v673_v36 = vsel %vm3714_vm8, %v392_v55, %v672_v10  ;;  %v3756_v63 = vpack.c.bf16 %v281_v53, %v281_v53  ;;  %v474_v0 = vrot.slane %v472_v9, 7  ;;  %v686_v23 = vld [vmem:[#allocation2 + $0x54] sm:$0xf] }
  0x4d   : > { %650 = vst [vmem:[#allocation2 + $0x14] sm:$0x1] %v649_v45  ;;  %v3758_v40 = vrot.slane %v480_v5, 7  ;;  %v677_v27 = vsel %vm3693_vm6, %v402_v58, %v676_v20  ;;  %v443_v24 = vor.u32 %v441_v43, %v3630_v32  ;;  %v489_v28 = vshrl.u32 %v3660_v1, 16  ;;  %v690_v37 = vld [vmem:[#allocation2 + $0x5c] sm:$0x1] }
  0x4e   : > { %644 = vst [vmem:[#allocation2 + $0xc] sm:$0xf] %v643_v57  ;;  %v497_v30 = vshrl.u32 %v3664_v6, 16  ;;  %v680_v34 = vsel %vm3714_vm8, %v409_v12, %v679_v16  ;;  %v282_v38 = vld [vmem:[%s3466_s24 + $0xf8] sm:$0xff]  ;;  %v460_v41 = vor.u32 %v458_v51, %v3728_v56  ;;  %v514_v45 = vshrl.u32 %v3668_v11, 16  ;;  %s2927_s24 = sshll.u32 %s4701_s13, 5 }
  0x4f   : > { %653 = vst [vmem:[#allocation2 + $0x18] sm:$0xf] %v652_v52  ;;  %v684_v32 = vsel %vm3693_vm6, %v419_v4, %v683_v15  ;;  %v693_v58 = vld [vmem:[#allocation2 + $0x60] sm:$0xf]  ;;  %v468_v43 = vor.u32 %v466_v18, %v3752_v2  ;;  %v470_v48 = vrot.slane %v3752_v2, 4  ;;  %v492_v49 = vshll.u32 %v3660_v1, 16  ;;  %s190_s25 = sadd.s32 %s2927_s24, %s4703_s23 }
  0x50   : > { %657 = vst [vmem:[#allocation2 + $0x20] sm:$0x1] %v656_v62  ;;  %v687_v57 = vsel %vm3714_vm8, %v426_v33, %v686_v23  ;;  %v697_v51 = vld [vmem:[#allocation2 + $0x68] sm:$0x1]  ;;  %v478_v52 = vrot.slane %v474_v0, 4  ;;  %v485_v17 = vor.u32 %v483_v26, %v3758_v40  ;;  %v500_v53 = vshll.u32 %v3664_v6, 16 }
  0x51   : > { %660 = vst [vmem:[#allocation2 + $0x24] sm:$0xf] %v659_v8  ;;  %v691_v4 = vsel %vm3693_vm6, %v436_v50, %v690_v37  ;;  %v700_v55 = vld [vmem:[#allocation2 + $0x6c] sm:$0xf]  ;;  %v491_v56 = vrot.slane %v489_v28, 7  ;;  %v499_v61 = vrot.slane %v497_v30, 7  ;;  %v694_v62 = vsel %vm3714_vm8, %v443_v24, %v693_v58 }
  0x52   : > { %664 = vst [vmem:[#allocation2 + $0x2c] sm:$0x1] %v663_v3  ;;  %v517_v1 = vshll.u32 %v3668_v11, 16  ;;  %v477_v54 = vor.u32 %v475_v22, %v474_v0  ;;  %v508_v9 = vrot.slane %v506_v42, 7  ;;  %v3787_v5 = vrot.slane %v514_v45, 7  ;;  %s2928_s12 = sshll.u32 %s190_s25, 3 }
  0x53   : > { %667 = vst [vmem:[#allocation2 + $0x30] sm:$0xf] %v666_v19  ;;  %v698_v25 = vsel %vm3693_vm6, %v453_v14, %v697_v51  ;;  %v704_v6 = vld [vmem:[#allocation2 + $0x74] sm:$0x1]  ;;  %v3791_v8 = vpack.c.bf16 %v282_v38, %v282_v38  ;;  %v487_v50 = vrot.slane %v3758_v40, 4  ;;  %v523_v3 = vshrl.u32 %v3674_v13, 16  ;;  %s4597_s29 = scalar_lea.vmem %s4679_s3, %s2928_s12 }
  0x54   : > { %671 = vst [vmem:[#allocation2 + $0x38] sm:$0x1] %v670_v35  ;;  %v701_v11 = vsel %vm3714_vm8, %v460_v41, %v700_v55  ;;  %v707_v10 = vld [vmem:[#allocation2 + $0x78] sm:$0xf]  ;;  %v469_v12 = vsel %vm3577_vm5, %v461_v59, %v468_v43  ;;  %v486_v18 = vsel %vm3577_vm5, %v478_v52, %v485_v17  ;;  %v509_v14 = vshll.u32 %v3666_v7, 16 }
  0x55   : > { %674 = vst [vmem:[#allocation2 + $0x3c] sm:$0xf] %v673_v36  ;;  %v531_v19 = vshrl.u32 %v3697_v46, 16  ;;  %v494_v20 = vor.u32 %v492_v49, %v491_v56  ;;  %v495_v22 = vrot.slane %v491_v56, 4  ;;  %v502_v26 = vor.u32 %v500_v53, %v499_v61  ;;  %v711_v16 = vld [vmem:[#allocation2 + $0x80] sm:$0x1] }
  0x56   : > { %678 = vst [vmem:[#allocation2 + $0x44] sm:$0x1] %v677_v27  ;;  %v705_v35 = vsel %vm3693_vm6, %v470_v48, %v704_v6  ;;  %v512_v33 = vrot.slane %v508_v9, 4  ;;  %v519_v2 = vor.u32 %v517_v1, %v3787_v5  ;;  %v540_v59 = vshrl.u32 %v3699_v29, 16  ;;  %v714_v36 = vld [vmem:[#allocation2 + $0x84] sm:$0xf] }
  0x57   : > { %681 = vst [vmem:[#allocation2 + $0x48] sm:$0xf] %v680_v34  ;;  %v708_v7 = vsel %vm3714_vm8, %v477_v54, %v707_v10  ;;  %v504_v15 = vrot.slane %v499_v61, 4  ;;  %v525_v0 = vrot.slane %v523_v3, 7  ;;  %v526_v40 = vshll.u32 %v3674_v13, 16 }
  0x58   : > { %685 = vst [vmem:[#allocation2 + $0x50] sm:$0x1] %v684_v32  ;;  %v548_v27 = vshrl.u32 %v3703_v31, 16  ;;  %v511_v23 = vor.u32 %v509_v14, %v508_v9  ;;  %v533_v24 = vrot.slane %v531_v19, 7  ;;  %v534_v28 = vshll.u32 %v3697_v46, 16 }
  0x59   : > { %688 = vst [vmem:[#allocation2 + $0x54] sm:$0xf] %v687_v57  ;;  %v712_v30 = vsel %vm3693_vm6, %v487_v50, %v711_v16  ;;  %v718_v34 = vld [vmem:[#allocation2 + $0x8c] sm:$0x1]  ;;  %v503_v37 = vsel %vm3577_vm5, %v495_v22, %v502_v26  ;;  %v521_v38 = vrot.slane %v3787_v5, 4  ;;  %v557_v13 = vshrl.u32 %v3705_v44, 16 }
  0x5a   : > { %692 = vst [vmem:[#allocation2 + $0x5c] sm:$0x1] %v691_v4  ;;  %v715_v41 = vsel %vm3714_vm8, %v494_v20, %v714_v36  ;;  %v721_v42 = vld [vmem:[#allocation2 + $0x90] sm:$0xf]  ;;  %v520_v46 = vsel %vm3577_vm5, %v512_v33, %v519_v2  ;;  %v542_v45 = vrot.slane %v540_v59, 7  ;;  %v543_v32 = vshll.u32 %v3699_v29, 16 }
  0x5b   : > { %695 = vst [vmem:[#allocation2 + $0x60] sm:$0xf] %v694_v62  ;;  %v565_v58 = vshrl.u32 %v3744_v21, 16  ;;  %v528_v43 = vor.u32 %v526_v40, %v525_v0  ;;  %v550_v48 = vrot.slane %v548_v27, 7  ;;  %v551_v49 = vshll.u32 %v3703_v31, 16 }
  0x5c   : > { %699 = vst [vmem:[#allocation2 + $0x68] sm:$0x1] %v698_v25  ;;  %v719_v57 = vsel %vm3693_vm6, %v504_v15, %v718_v34  ;;  %v725_v51 = vld [vmem:[#allocation2 + $0x98] sm:$0x1]  ;;  %v529_v52 = vrot.slane %v525_v0, 4  ;;  %v536_v17 = vor.u32 %v534_v28, %v533_v24  ;;  %v574_v53 = vshrl.u32 %v3756_v63, 16 }
  0x5d   : > { %702 = vst [vmem:[#allocation2 + $0x6c] sm:$0xf] %v701_v11  ;;  %v722_v29 = vsel %vm3714_vm8, %v511_v23, %v721_v42  ;;  %v728_v4 = vld [vmem:[#allocation2 + $0x9c] sm:$0xf]  ;;  %v538_v55 = vrot.slane %v533_v24, 4  ;;  %v559_v56 = vrot.slane %v557_v13, 7  ;;  %v545_v1 = vor.u32 %v543_v32, %v542_v45 }
  0x5e   : > { %703 = vst.msk [vmem:[#allocation2 + $0x70] sm:$0xf] %vm195_vm1, %v469_v12  ;;  %v560_v61 = vshll.u32 %v3705_v44, 16  ;;  %v582_v31 = vshrl.u32 %v3791_v8, 16  ;;  %v567_v62 = vrot.slane %v565_v58, 7  ;;  %v568_v54 = vshll.u32 %v3744_v21, 16 }
  0x5f   : > { %706 = vst [vmem:[#allocation2 + $0x74] sm:$0x1] %v705_v35  ;;  %v726_v9 = vsel %vm3693_vm6, %v521_v38, %v725_v51  ;;  %v732_v5 = vld [vmem:[#allocation2 + $0xa4] sm:$0x1]  ;;  %v546_v25 = vrot.slane %v542_v45, 4  ;;  %v553_v6 = vor.u32 %v551_v49, %v550_v48  ;;  %v729_v50 = vsel %vm3714_vm8, %v528_v43, %v728_v4 }
  0x60   : > { %709 = vst [vmem:[#allocation2 + $0x78] sm:$0xf] %v708_v7  ;;  %v735_v44 = vld [vmem:[#allocation2 + $0xa8] sm:$0xf]  ;;  %v537_v3 = vsel %vm3577_vm5, %v529_v52, %v536_v17  ;;  %v555_v11 = vrot.slane %v550_v48, 4  ;;  %v576_v10 = vrot.slane %v574_v53, 7  ;;  %v562_v21 = vor.u32 %v560_v61, %v559_v56 }
  0x61   : > { %710 = vst.msk [vmem:[#allocation2 + $0x7c] sm:$0xf] %vm195_vm1, %v486_v18  ;;  %v577_v12 = vshll.u32 %v3756_v63, 16  ;;  %v584_v18 = vrot.slane %v582_v31, 7  ;;  %v585_v14 = vshll.u32 %v3791_v8, 16  ;;  %v733_v19 = vsel %vm3693_vm6, %v538_v55, %v732_v5 }
  0x62   : > { %713 = vst [vmem:[#allocation2 + $0x80] sm:$0x1] %v712_v30  ;;  %v739_v20 = vld [vmem:[#allocation2 + $0xb0] sm:$0x1]  ;;  %v563_v22 = vrot.slane %v559_v56, 4  ;;  %v570_v26 = vor.u32 %v568_v54, %v567_v62  ;;  %v736_v35 = vsel %vm3714_vm8, %v545_v1, %v735_v44  ;;  %v554_v63 = vsel %vm3577_vm5, %v546_v25, %v553_v6 }
  0x63   : > { %716 = vst [vmem:[#allocation2 + $0x84] sm:$0xf] %v715_v41  ;;  %v742_v16 = vld [vmem:[#allocation2 + $0xb4] sm:$0xf]  ;;  %v572_v33 = vrot.slane %v567_v62, 4  ;;  %v579_v2 = vor.u32 %v577_v12, %v576_v10  ;;  %v740_v8 = vsel %vm3693_vm6, %v555_v11, %v739_v20  ;;  %v580_v7 = vrot.slane %v576_v10, 4 }
  0x64   : > { %717 = vst.msk [vmem:[#allocation2 + $0x88] sm:$0xf] %vm195_vm1, %v503_v37  ;;  %v746_v59 = vld [vmem:[#allocation2 + $0xbc] sm:$0x1]  ;;  %v587_v36 = vor.u32 %v585_v14, %v584_v18  ;;  %v743_v15 = vsel %vm3714_vm8, %v562_v21, %v742_v16  ;;  %v749_v0 = vld [vmem:[#allocation2 + $0xc0] sm:$0xf]  ;;  %v571_v40 = vsel %vm3577_vm5, %v563_v22, %v570_v26 }
  0x65   : > { %720 = vst [vmem:[#allocation2 + $0x8c] sm:$0x1] %v719_v57  ;;  %v589_v27 = vrot.slane %v584_v18, 4  ;;  %v747_v23 = vsel %vm3693_vm6, %v572_v33, %v746_v59  ;;  %v753_v24 = vld [vmem:[#allocation2 + $0xc8] sm:$0x1]  ;;  %v750_v28 = vsel %vm3714_vm8, %v579_v2, %v749_v0  ;;  %v1488_v13 = vsel %vm1031_vm0, %v3016_v60, 0 }
  0x66   : > { %723 = vst [vmem:[#allocation2 + $0x90] sm:$0xf] %v722_v29  ;;  %v588_v30 = vsel %vm3577_vm5, %v580_v7, %v587_v36  ;;  %v2989_v37 = vld [vmem:[%s4677_s1 + $0x4] sm:$0x3]  ;;  %v1149_v41 = vsel %vm1031_vm0, %v776_v39, 0  ;;  %v1822_v42 = vsel %vm1031_vm0, %v3081_v47, 0  ;;  %1497 = vmatpush.bf16.msrb.mxu3 %v1488_v13 }
  0x67   : > { %724 = vst.msk [vmem:[#allocation2 + $0x94] sm:$0xf] %vm195_vm1, %v520_v46  ;;  %v754_v34 = vsel %vm3693_vm6, %v589_v27, %v753_v24  ;;  %v1334_v38 = vsel %vm1031_vm0, %v2989_v37, 0  ;;  %1158 = vmatpush.bf16.msrb.mxu1 %v1149_v41  ;;  %1831 = vmatpush.bf16.msrb.mxu0 %v1822_v42 }
  0x68   : > { %727 = vst [vmem:[#allocation2 + $0x98] sm:$0x1] %v726_v9  ;;  %1343 = vmatpush.bf16.msrb.mxu2 %v1334_v38 }
  0x69   : > { %730 = vst [vmem:[#allocation2 + $0x9c] sm:$0xf] %v729_v50 }
  0x6a   : > { %731 = vst.msk [vmem:[#allocation2 + $0xa0] sm:$0xf] %vm195_vm1, %v537_v3 }
  0x6b   : > { %734 = vst [vmem:[#allocation2 + $0xa4] sm:$0x1] %v733_v19 }
  0x6c   : > { %737 = vst [vmem:[#allocation2 + $0xa8] sm:$0xf] %v736_v35 }
  0x6d   : > { %738 = vst.msk [vmem:[#allocation2 + $0xac] sm:$0xf] %vm195_vm1, %v554_v63 }
  0x6e   : > { %741 = vst [vmem:[#allocation2 + $0xb0] sm:$0x1] %v740_v8 }
  0x6f   : > { %744 = vst [vmem:[#allocation2 + $0xb4] sm:$0xf] %v743_v15 }
  0x70   : > { %745 = vst.msk [vmem:[#allocation2 + $0xb8] sm:$0xf] %vm195_vm1, %v571_v40 }
  0x71   : > { %748 = vst [vmem:[#allocation2 + $0xbc] sm:$0x1] %v747_v23 }
  0x72   : > { %751 = vst [vmem:[#allocation2 + $0xc0] sm:$0xf] %v750_v28 }
  0x73   : > { %752 = vst.msk [vmem:[#allocation2 + $0xc4] sm:$0xf] %vm195_vm1, %v588_v30 }
  0x74   : > { %755 = vst [vmem:[#allocation2 + $0xc8] sm:$0x1] %v754_v34 }
  0x7b   : > { %v764_v46 = vld [vmem:[%s3886_s7 + $0x18] sm:$0xf]  ;;  %v3890_v45 = vld [vmem:[%s3886_s7 + $0x1c] sm:$0xf]  ;;  %v3893_v32 = vld [vmem:[%s3886_s7 + $0x20] sm:$0x1] }
  0x7c   : > { %v837_v58 = vshrl.u32 %v764_v46, 16  ;;  %v840_v43 = vshll.u32 %v764_v46, 16  ;;  %v846_v48 = vshll.u32 %v3890_v45, 16  ;;  %v850_v49 = vshrl.u32 %v3890_v45, 16  ;;  %v768_v57 = vld [vmem:[%s3886_s7 + $0x30] sm:$0xf] }
  0x7d   : > { %v856_v51 = vshll.u32 %v3893_v32, 16  ;;  %v3900_v52 = vld [vmem:[%s3886_s7 + $0x34] sm:$0xf]  ;;  %v3903_v17 = vld [vmem:[%s3886_s7 + $0x38] sm:$0x1]  ;;  %v885_v53 = vshrl.u32 %v768_v57, 16 }
  0x7e   : > { %v839_v29 = vrot.slane %v837_v58, 4  ;;  %v842_v4 = vrot.slane %v840_v43, 5  ;;  %v848_v55 = vrot.slane %v846_v48, 5  ;;  %v852_v56 = vrot.slane %v850_v49, 4  ;;  %v772_v61 = vld [vmem:[%s3886_s7 + $0x48] sm:$0xf] }
  0x7f   : > { %v858_v31 = vrot.slane %v856_v51, 5  ;;  %v887_v1 = vrot.slane %v885_v53, 4  ;;  %v888_v62 = vshll.u32 %v768_v57, 16  ;;  %v894_v54 = vshll.u32 %v3900_v52, 16  ;;  %v3910_v50 = vld [vmem:[%s3886_s7 + $0x4c] sm:$0xf] }
  0x80   : > { %v843_v9 = vor.u32 %v842_v4, %v839_v29  ;;  %v853_v5 = vor.u32 %v852_v56, %v848_v55  ;;  %v898_v25 = vshrl.u32 %v3900_v52, 16  ;;  %v904_v6 = vshll.u32 %v3903_v17, 16  ;;  %v3919_v22 = vld [vmem:[%s3886_s7 + $0x50] sm:$0x1]  ;;  %v760_v59 = vld [vmem:[%s3886_s7] sm:$0xf] }
  0x81   : > { %v890_v3 = vrot.slane %v888_v62, 5  ;;  %v896_v11 = vrot.slane %v894_v54, 5  ;;  %v933_v10 = vshrl.u32 %v772_v61, 16  ;;  %v936_v12 = vshll.u32 %v772_v61, 16  ;;  %v3932_v37 = vld [vmem:[%s3886_s7 + $0x4] sm:$0xf] }
  0x82   : > { %v844_v21 = vrot.slane %v843_v9, 4  ;;  %v854_v18 = vrot.slane %v853_v5, 4  ;;  %v900_v14 = vrot.slane %v898_v25, 4  ;;  %v906_v19 = vrot.slane %v904_v6, 5  ;;  %v3937_v41 = vld [vmem:[%s3886_s7 + $0x8] sm:$0x1] }
  0x83   : > { %v891_v20 = vor.u32 %v890_v3, %v887_v1  ;;  %v935_v26 = vrot.slane %v933_v10, 4  ;;  %v938_v35 = vrot.slane %v936_v12, 5  ;;  %v942_v16 = vshll.u32 %v3910_v50, 16  ;;  %v766_v48 = vld [vmem:[%s3886_s7 + $0x24] sm:$0xf] }
  0x84   : > { %v849_v63 = vsel %vm3914_vm12, %v844_v21, %v848_v55  ;;  %v859_v33 = vsel %vm3914_vm12, %v854_v18, %v858_v31  ;;  %v901_v2 = vor.u32 %v900_v14, %v896_v11  ;;  %v946_v8 = vshrl.u32 %v3910_v50, 16  ;;  %v3948_v61 = vld [vmem:[%s3886_s7 + $0x28] sm:$0xf]  ;;  %v3953_v54 = vld [vmem:[%s3886_s7 + $0x2c] sm:$0x1] }
  0x85   : > { %v986_v7 = vunpack.c.l.b16 %v849_v63  ;;  %v987_v36 = vunpack.c.l.b16 %v859_v33  ;;  %v892_v15 = vrot.slane %v891_v20, 4  ;;  %v939_v0 = vor.u32 %v938_v35, %v935_v26  ;;  %v3961_v33 = vld [vmem:[%s3886_s7 + $0x40] sm:$0xf] }
  0x86   : > { %v902_v40 = vrot.slane %v901_v2, 4  ;;  %v944_v27 = vrot.slane %v942_v16, 5  ;;  %v948_v23 = vrot.slane %v946_v8, 4  ;;  %v952_v24 = vshll.u32 %v3919_v22, 16 }
  0x87   : > { %v1000_v28 = vpack.c.b16 %v987_v36, %v986_v7  ;;  %v897_v30 = vsel %vm3914_vm12, %v892_v15, %v896_v11  ;;  %v940_v34 = vrot.slane %v939_v0, 4  ;;  %v789_v38 = vshrl.u32 %v760_v59, 16  ;;  %v770_v11 = vld [vmem:[%s3886_s7 + $0x3c] sm:$0xf]  ;;  %v3967_v36 = vld [vmem:[%s3886_s7 + $0x44] sm:$0x1] }
  0x88   : > { %v907_v60 = vsel %vm3914_vm12, %v902_v40, %v906_v19  ;;  %v990_v39 = vunpack.c.l.b16 %v897_v30  ;;  %v949_v47 = vor.u32 %v948_v23, %v944_v27  ;;  %v954_v13 = vrot.slane %v952_v24, 5  ;;  %v774_v0 = vld [vmem:[%s3886_s7 + $0x54] sm:$0xf] }
  0x89   : > { %2935 = vmatmul.msk.bf16.vlgmr.msra.gmra.mxu1 %vm1006_vm11, %v1000_v28  ;;  %v991_v42 = vunpack.c.l.b16 %v907_v60  ;;  %v945_v46 = vsel %vm3914_vm12, %v940_v34, %v944_v27  ;;  %v791_v58 = vrot.slane %v789_v38, 4  ;;  %v792_v43 = vshll.u32 %v760_v59, 16 }
  0x8a   : > { %v950_v49 = vrot.slane %v949_v47, 4  ;;  %v994_v57 = vunpack.c.l.b16 %v945_v46  ;;  %v798_v51 = vshll.u32 %v3932_v37, 16  ;;  %v802_v53 = vshrl.u32 %v3932_v37, 16 }
  0x8b   : > { %v1002_v29 = vpack.c.b16 %v991_v42, %v990_v39  ;;  %v794_v4 = vrot.slane %v792_v43, 5  ;;  %v808_v55 = vshll.u32 %v3937_v41, 16  ;;  %v1232_v56 = vrot.slane %v3937_v41, 5 }
  0x8c   : > { %v955_v31 = vsel %vm3914_vm12, %v950_v49, %v954_v13  ;;  %v800_v1 = vrot.slane %v798_v51, 5  ;;  %v804_v62 = vrot.slane %v802_v53, 4  ;;  %v861_v9 = vshrl.u32 %v766_v48, 16  ;;  %v3981_v49 = vld [vmem:[%s3886_s7 + $0x5c] sm:$0x1] }
  0x8d   : > { %2937 = vmatmul.msk.bf16.vlgmr.msra.gmra.mxu2 %vm1006_vm11, %v1002_v29  ;;  %v995_v5 = vunpack.c.l.b16 %v955_v31  ;;  %v795_v25 = vor.u32 %v794_v4, %v791_v58  ;;  %v810_v6 = vrot.slane %v808_v55, 5  ;;  %v864_v3 = vshll.u32 %v766_v48, 16  ;;  %v3978_v48 = vld [vmem:[%s3886_s7 + $0x58] sm:$0xf]  ;;  %v762_v4 = vld [vmem:[%s3886_s7 + $0xc] sm:$0xf] }
  0x8e   : > { %v805_v10 = vor.u32 %v804_v62, %v800_v1  ;;  %v863_v12 = vrot.slane %v861_v9, 4  ;;  %v870_v21 = vshll.u32 %v3948_v61, 16  ;;  %v874_v18 = vshrl.u32 %v3948_v61, 16 }
  0x8f   : > { %v1004_v14 = vpack.c.b16 %v995_v5, %v994_v57  ;;  %v796_v19 = vrot.slane %v795_v25, 4  ;;  %v866_v20 = vrot.slane %v864_v3, 5  ;;  %v880_v26 = vshll.u32 %v3953_v54, 16 }
  0x90   : > { %v806_v35 = vrot.slane %v805_v10, 4  ;;  %v872_v16 = vrot.slane %v870_v21, 5  ;;  %v876_v63 = vrot.slane %v874_v18, 4  ;;  %v909_v2 = vshrl.u32 %v770_v11, 16 }
  0x91   : > { %2939 = vmatmul.msk.bf16.vlgmr.msra.gmra.mxu3 %vm1006_vm11, %v1004_v14  ;;  %v801_v8 = vsel %vm3914_vm12, %v796_v19, %v800_v1  ;;  %v867_v59 = vor.u32 %v866_v20, %v863_v12  ;;  %v882_v7 = vrot.slane %v880_v26, 5  ;;  %v912_v15 = vshll.u32 %v770_v11, 16  ;;  %v3993_v12 = vld [vmem:[%s3886_s7 + $0x10] sm:$0xf]  ;;  %v3996_v26 = vld [vmem:[%s3886_s7 + $0x14] sm:$0x1] }
  0x92   : > { %v811_v40 = vsel %vm3914_vm12, %v806_v35, %v810_v6  ;;  %v982_v27 = vunpack.c.l.b16 %v801_v8  ;;  %v877_v23 = vor.u32 %v876_v63, %v872_v16  ;;  %v911_v24 = vrot.slane %v909_v2, 4 }
  0x93   : > { %v983_v28 = vunpack.c.l.b16 %v811_v40  ;;  %v868_v30 = vrot.slane %v867_v59, 4  ;;  %v914_v34 = vrot.slane %v912_v15, 5  ;;  %v918_v38 = vshll.u32 %v3961_v33, 16 }
  0x94   : > { %v878_v60 = vrot.slane %v877_v23, 4  ;;  %v922_v39 = vshrl.u32 %v3961_v33, 16  ;;  %v928_v47 = vshll.u32 %v3967_v36, 16  ;;  %v957_v13 = vshrl.u32 %v774_v0, 16 }
  0x95   : > { %v998_v42 = vpack.c.b16 %v983_v28, %v982_v27  ;;  %v873_v46 = vsel %vm3914_vm12, %v868_v30, %v872_v16  ;;  %v915_v58 = vor.u32 %v914_v34, %v911_v24  ;;  %v920_v43 = vrot.slane %v918_v38, 5  ;;  %v1200_v34 = vld [vmem:[%s3886_s7] sm:$0xe] }
  0x96   : > { %v883_v57 = vsel %vm3914_vm12, %v878_v60, %v882_v7  ;;  %v988_v51 = vunpack.c.l.b16 %v873_v46  ;;  %v924_v53 = vrot.slane %v922_v39, 4  ;;  %v930_v29 = vrot.slane %v928_v47, 5 }
  0x97   : > { %2933 = vmatmul.msk.bf16.vlgmr.msra.gmra.mxu0 %vm1006_vm11, %v998_v42  ;;  %v989_v55 = vunpack.c.l.b16 %v883_v57  ;;  %v916_v31 = vrot.slane %v915_v58, 4  ;;  %v959_v1 = vrot.slane %v957_v13, 4  ;;  %v960_v62 = vshll.u32 %v774_v0, 16  ;;  %v3133_v13 = vld [vmem:[%s4677_s1 + $0xc] sm:$0x3] }
  0x98   : > { %v925_v9 = vor.u32 %v924_v53, %v920_v43  ;;  %v966_v5 = vshll.u32 %v3978_v48, 16  ;;  %v970_v25 = vshrl.u32 %v3978_v48, 16  ;;  %v976_v6 = vshll.u32 %v3981_v49, 16  ;;  %v3057_v42 = vld [vmem:[%s3886_s7 + $0xc] sm:$0xf] }
  0x99   : > { %v1001_v3 = vpack.c.b16 %v989_v55, %v988_v51  ;;  %v921_v11 = vsel %vm3914_vm12, %v916_v31, %v920_v43  ;;  %v962_v10 = vrot.slane %v960_v62, 5  ;;  %v813_v21 = vshrl.u32 %v762_v4, 16  ;;  %v4017_v31 = vld [vmem:[%s3886_s7 + $0x10] sm:$0xf] }
  0x9a   : > { %v926_v18 = vrot.slane %v925_v9, 4  ;;  %v992_v14 = vunpack.c.l.b16 %v921_v11  ;;  %v968_v19 = vrot.slane %v966_v5, 5  ;;  %v972_v20 = vrot.slane %v970_v25, 4 }
  0x9b   : > { %2936 = vmatmul.msk.bf16.gmra.mxu1 %vm1006_vm11, %v1001_v3  ;;  %v963_v35 = vor.u32 %v962_v10, %v959_v1  ;;  %v978_v16 = vrot.slane %v976_v6, 5  ;;  %v815_v63 = vrot.slane %v813_v21, 4  ;;  %v816_v2 = vshll.u32 %v762_v4, 16  ;;  %v4027_v3 = vld [vmem:[%s3886_s7 + $0x14] sm:$0x1] }
  0x9c   : > { %v931_v8 = vsel %vm3914_vm12, %v926_v18, %v930_v29  ;;  %v973_v59 = vor.u32 %v972_v20, %v968_v19  ;;  %v822_v7 = vshll.u32 %v3993_v12, 16  ;;  %v826_v15 = vshrl.u32 %v3993_v12, 16  ;;  %v3198_v21 = vld [vmem:[%s4677_s1 + $0xe] sm:$0x3]  ;;  %v3106_v20 = vld [vmem:[%s4677_s1 + $0xa] sm:$0x3] }
  0x9d   : > { %v993_v0 = vunpack.c.l.b16 %v931_v8  ;;  %v964_v40 = vrot.slane %v963_v35, 4  ;;  %v818_v27 = vrot.slane %v816_v2, 5  ;;  %v832_v23 = vshll.u32 %v3996_v26, 16  ;;  %v3223_v8 = vld [vmem:[%s4677_s1 + $0x10] sm:$0x3] }
  0x9e   : > { %v974_v24 = vrot.slane %v973_v59, 4  ;;  %v824_v28 = vrot.slane %v822_v7, 5  ;;  %v828_v30 = vrot.slane %v826_v15, 4  ;;  %v2981_v53 = vrot.slane %v1200_v34, 9  ;;  %v3236_v7 = vld [vmem:[%s3886_s7] sm:$0xff] }
  0x9f   : > { %v1003_v38 = vpack.c.b16 %v993_v0, %v992_v14  ;;  %v969_v60 = vsel %vm3914_vm12, %v964_v40, %v968_v19  ;;  %v819_v39 = vor.u32 %v818_v27, %v815_v63  ;;  %v834_v47 = vrot.slane %v832_v23, 5 }
  0xa0   : > { %v979_v46 = vsel %vm3914_vm12, %v974_v24, %v978_v16  ;;  %v996_v58 = vunpack.c.l.b16 %v969_v60  ;;  %v829_v43 = vor.u32 %v828_v30, %v824_v28  ;;  %v1229_v29 = vrot.slane %v3932_v37, 5  ;;  %v4058_v60 = vld [vmem:[%s3886_s7 + $0x1c] sm:$0xf] }
  0xa1   : > { %2938 = vmatmul.msk.bf16.gmra.mxu2 %vm1006_vm11, %v1003_v38  ;;  %v997_v57 = vunpack.c.l.b16 %v979_v46  ;;  %v820_v51 = vrot.slane %v819_v39, 4  ;;  %v2182_v55 = vsel %vm1031_vm0, %v3133_v13, 0  ;;  %v1580_v1 = vshrl.u32 %v3057_v42, 16  ;;  %v3060_v38 = vld [vmem:[%s3886_s7 + $0x18] sm:$0xf] }
  0xa2   : > { %v830_v4 = vrot.slane %v829_v43, 4  ;;  %v1583_v62 = vshll.u32 %v3057_v42, 16  ;;  %v1231_v6 = vrot.slane %v1229_v29, 4  ;;  %2191 = vmatpush.bf16.msra.mxu2 %v2182_v55  ;;  %v1589_v19 = vshll.u32 %v4017_v31, 16  ;;  %v1202_v39 = vld [vmem:[%s3886_s7 + $0x18] sm:$0xe] }
  0xa3   : > { %v1005_v9 = vpack.c.b16 %v997_v57, %v996_v58  ;;  %v825_v5 = vsel %vm3914_vm12, %v820_v51, %v824_v28  ;;  %v1582_v10 = vrot.slane %v1580_v1, 4  ;;  %v1230_v35 = vsel %vm4022_vm15, %v2981_v53, %v1229_v29  ;;  %v1201_v13 = vld [vmem:[%s3886_s7 + $0xc] sm:$0xe] }
  0xa4   : > { %v835_v37 = vsel %vm3914_vm12, %v830_v4, %v834_v47  ;;  %v984_v11 = vunpack.c.l.b16 %v825_v5  ;;  %v1585_v14 = vrot.slane %v1583_v62, 5  ;;  %v1233_v16 = vsel %vm4022_vm15, %v1231_v6, %v1232_v56  ;;  %v3244_v6 = vld [vmem:[%s3886_s7 + $0xc] sm:$0xff] }
  0xa5   : > { %2940 = vmatmul.msk.bf16.gmra.mxu3 %vm1006_vm11, %v1005_v9  ;;  %v985_v18 = vunpack.c.l.b16 %v835_v37  ;;  %v1593_v63 = vshrl.u32 %v4017_v31, 16  ;;  %v1599_v2 = vshll.u32 %v4027_v3, 16  ;;  %v1591_v0 = vrot.slane %v1589_v19, 5 }
  0xa6   : > { %v1586_v15 = vor.u32 %v1585_v14, %v1582_v10  ;;  %v2516_v40 = vsel %vm1031_vm0, %v3198_v21, 0  ;;  %v2028_v56 = vsel %vm1031_vm0, %v3106_v20, 0  ;;  %v1285_v27 = vunpack.c.l.b16 %v1230_v35 }
  0xa7   : > { %v999_v59 = vpack.c.b16 %v985_v18, %v984_v11  ;;  %v1595_v41 = vrot.slane %v1593_v63, 4  ;;  %2525 = vmatpush.bf16.msra.mxu3 %v2516_v40  ;;  %v1286_v23 = vunpack.c.l.b16 %v1233_v16  ;;  %2037 = vmatpush.bf16.msra.mxu1 %v2028_v56  ;;  %v2722_v28 = vsel %vm1031_vm0, %v3223_v8, 0 }
  0xa8   : > { %v1587_v24 = vrot.slane %v1586_v15, 4  ;;  %v1601_v34 = vrot.slane %v1599_v2, 5  ;;  %2731 = vmatpush.bf16.msra.mxu0 %v2722_v28  ;;  %v1236_v42 = vrot.slane %v3993_v12, 5  ;;  %v1604_v43 = vshrl.u32 %v3060_v38, 16  ;;  %v1203_v28 = vld [vmem:[%s3886_s7 + $0x24] sm:$0xe] }
  0xa9   : > { %2934 = vmatmul.msk.bf16.gmra.mxu0 %vm1006_vm11, %v999_v59  ;;  %v1596_v30 = vor.u32 %v1595_v41, %v1591_v0  ;;  %v1301_v46 = vpack.c.b16 %v1286_v23, %v1285_v27  ;;  %v1607_v57 = vshll.u32 %v3060_v38, 16  ;;  %v1613_v53 = vshll.u32 %v4058_v60, 16  ;;  %v3063_v23 = vld [vmem:[%s3886_s7 + $0x24] sm:$0xf] }
  0xaa   : > { %v1592_v58 = vsel %vm3914_vm12, %v1587_v24, %v1591_v0  ;;  %v1617_v29 = vshrl.u32 %v4058_v60, 16  ;;  %v2983_v4 = vrot.slane %v1202_v39, 9  ;;  %v2982_v55 = vrot.slane %v1201_v13, 9  ;;  %v4092_v24 = vld [vmem:[%s3886_s7 + $0x28] sm:$0xf] }
  0xab   : > { %2973 = vmatmul.msk.bf16.vlgmr.msrb.gmra.mxu1 %vm1006_vm11, %v3236_v7  ;;  %v1597_v47 = vrot.slane %v1596_v30, 4  ;;  %v1243_v1 = vrot.slane %v3890_v45, 5  ;;  %v1773_v12 = vunpack.c.l.b16 %v1592_v58  ;;  %v1238_v62 = vrot.slane %v1236_v42, 4  ;;  %v4077_v45 = vld [vmem:[%s3886_s7 + $0x20] sm:$0x1]  ;;  %v3237_v7 = vld [vmem:[%s3886_s7 + $0xc] sm:$0xff] }
  0xac   : > { %v1239_v9 = vrot.slane %v3996_v26, 5  ;;  %v1246_v5 = vrot.slane %v3893_v32, 5  ;;  %v1606_v11 = vrot.slane %v1604_v43, 4  ;;  %v1609_v10 = vrot.slane %v1607_v57, 5 }
  0xad   : > { %v1602_v51 = vsel %vm3914_vm12, %v1597_v47, %v1601_v34  ;;  %v1244_v21 = vsel %vm4022_vm15, %v2983_v4, %v1243_v1  ;;  %v1615_v18 = vrot.slane %v1613_v53, 5  ;;  %v1619_v14 = vrot.slane %v1617_v29, 4  ;;  %v3245_v29 = vld [vmem:[%s3886_s7 + $0x18] sm:$0xff] }
  0xae   : > { %v1774_v37 = vunpack.c.l.b16 %v1602_v51  ;;  %v1245_v19 = vrot.slane %v1243_v1, 4  ;;  %v1289_v20 = vunpack.c.l.b16 %v1244_v21  ;;  %v1237_v26 = vsel %vm4022_vm15, %v2982_v55, %v1236_v42 }
  0xaf   : > { %v1240_v16 = vsel %vm4022_vm15, %v1238_v62, %v1239_v9  ;;  %v1610_v63 = vor.u32 %v1609_v10, %v1606_v11  ;;  %v1620_v8 = vor.u32 %v1619_v14, %v1615_v18  ;;  %v1623_v59 = vshll.u32 %v4077_v45, 16  ;;  %v3066_v14 = vld [vmem:[%s3886_s7 + $0x30] sm:$0xf] }
  0xb0   : > { %v1247_v32 = vsel %vm4022_vm15, %v1245_v19, %v1246_v5  ;;  %v1789_v35 = vpack.c.b16 %v1774_v37, %v1773_v12  ;;  %v1287_v0 = vunpack.c.l.b16 %v1237_v26  ;;  %v1288_v40 = vunpack.c.l.b16 %v1240_v16  ;;  %v4118_v19 = vld [vmem:[%s3886_s7 + $0x34] sm:$0xf] }
  0xb1   : > { %2990 = vmatmul.msk.bf16.vlgmr.msrb.gmra.mxu2 %vm1006_vm11, %v1301_v46  ;;  %v1290_v2 = vunpack.c.l.b16 %v1247_v32  ;;  %v1611_v41 = vrot.slane %v1610_v63, 4  ;;  %v1621_v56 = vrot.slane %v1620_v8, 4  ;;  %v1625_v27 = vrot.slane %v1623_v59, 5 }
  0xb2   : > { %v1250_v30 = vrot.slane %v3948_v61, 5  ;;  %v1253_v34 = vrot.slane %v3953_v54, 5  ;;  %v1302_v38 = vpack.c.b16 %v1288_v40, %v1287_v0  ;;  %v2984_v39 = vrot.slane %v1203_v28, 9  ;;  %v4130_v28 = vld [vmem:[%s3886_s7 + $0x38] sm:$0x1] }
  0xb3   : > { %v1303_v15 = vpack.c.b16 %v1290_v2, %v1289_v20  ;;  %v1616_v47 = vsel %vm3914_vm12, %v1611_v41, %v1615_v18  ;;  %v1628_v13 = vshrl.u32 %v3063_v23, 16  ;;  %v1631_v42 = vshll.u32 %v3063_v23, 16  ;;  %v3238_v18 = vld [vmem:[%s3886_s7 + $0x18] sm:$0xff] }
  0xb4   : > { %v1252_v46 = vrot.slane %v1250_v30, 4  ;;  %v1626_v58 = vsel %vm3914_vm12, %v1621_v56, %v1625_v27  ;;  %v1637_v43 = vshll.u32 %v4092_v24, 16  ;;  %v1641_v57 = vshrl.u32 %v4092_v24, 16  ;;  %v3246_v56 = vld [vmem:[%s3886_s7 + $0x24] sm:$0xff] }
  0xb5   : > { %3049 = vmatmul.msk.bf16.vlgmr.msrb.gmra.mxu3 %vm1006_vm11, %v3244_v6  ;;  %v1251_v61 = vsel %vm4022_vm15, %v2984_v39, %v1250_v30  ;;  %v1775_v4 = vunpack.c.l.b16 %v1616_v47  ;;  %v1776_v55 = vunpack.c.l.b16 %v1626_v58  ;;  %v1630_v1 = vrot.slane %v1628_v13, 4  ;;  %v4110_v6 = vld [vmem:[%s3886_s7 + $0x2c] sm:$0x1]  ;;  %v3239_v47 = vld [vmem:[%s3886_s7 + $0x24] sm:$0xff]  ;;  %v4138_v58 = vld [vmem:[%s3886_s7 + $0x40] sm:$0xf] }
  0xb6   : > { %v1254_v54 = vsel %vm4022_vm15, %v1252_v46, %v1253_v34  ;;  %v1291_v51 = vunpack.c.l.b16 %v1251_v61  ;;  %v1633_v12 = vrot.slane %v1631_v42, 5  ;;  %v1639_v62 = vrot.slane %v1637_v43, 5  ;;  %v1204_v61 = vld [vmem:[%s3886_s7 + $0x30] sm:$0xe] }
  0xb7   : > { %v1292_v53 = vunpack.c.l.b16 %v1254_v54  ;;  %v1643_v9 = vrot.slane %v1641_v57, 4  ;;  %v1790_v37 = vpack.c.b16 %v1776_v55, %v1775_v4  ;;  %v1647_v21 = vshll.u32 %v4110_v6, 16 }
  0xb8   : > { %v1634_v11 = vor.u32 %v1633_v12, %v1630_v1  ;;  %v1655_v16 = vshll.u32 %v3066_v14, 16  ;;  %v1661_v63 = vshll.u32 %v4118_v19, 16  ;;  %v1665_v2 = vshrl.u32 %v4118_v19, 16 }
  0xb9   : > { %3082 = vmatmul.msk.bf16.vlgmr.msrb.gmra.mxu0 %vm1006_vm11, %v1789_v35  ;;  %v1304_v5 = vpack.c.b16 %v1292_v53, %v1291_v51  ;;  %v1644_v10 = vor.u32 %v1643_v9, %v1639_v62  ;;  %v1649_v32 = vrot.slane %v1647_v21, 5  ;;  %v1652_v35 = vshrl.u32 %v3066_v14, 16  ;;  %v4153_v14 = vld [vmem:[%s3886_s7 + $0x44] sm:$0x1] }
  0xba   : > { %v1635_v20 = vrot.slane %v1634_v11, 4  ;;  %v1657_v0 = vrot.slane %v1655_v16, 5  ;;  %v1663_v40 = vrot.slane %v1661_v63, 5  ;;  %v1667_v41 = vrot.slane %v1665_v2, 4  ;;  %v3240_v16 = vld [vmem:[%s3886_s7 + $0x30] sm:$0xff] }
  0xbb   : > { %2974 = vmatmul.msk.bf16.gmra.mxu1 %vm1006_vm11, %v3237_v7  ;;  %v1645_v26 = vrot.slane %v1644_v10, 4  ;;  %v1654_v7 = vrot.slane %v1652_v35, 4  ;;  %v1685_v53 = vshll.u32 %v4138_v58, 16  ;;  %v1257_v4 = vrot.slane %v3900_v52, 5 }
  0xbc   : > { %v1640_v8 = vsel %vm3914_vm12, %v1635_v20, %v1639_v62  ;;  %v1668_v34 = vor.u32 %v1667_v41, %v1663_v40  ;;  %v2985_v12 = vrot.slane %v1204_v61, 9  ;;  %v3247_v62 = vld [vmem:[%s3886_s7 + $0x30] sm:$0xff] }
  0xbd   : > { %v1650_v59 = vsel %vm3914_vm12, %v1645_v26, %v1649_v32  ;;  %v1777_v27 = vunpack.c.l.b16 %v1640_v8  ;;  %v1658_v30 = vor.u32 %v1657_v0, %v1654_v7  ;;  %v1687_v11 = vrot.slane %v1685_v53, 5  ;;  %v3072_v7 = vld [vmem:[%s3886_s7 + $0x48] sm:$0xf]  ;;  %v4166_v0 = vld [vmem:[%s3886_s7 + $0x4c] sm:$0xf] }
  0xbe   : > { %v1778_v23 = vunpack.c.l.b16 %v1650_v59  ;;  %v1669_v42 = vrot.slane %v1668_v34, 4  ;;  %v1259_v21 = vrot.slane %v1257_v4, 4  ;;  %v1258_v52 = vsel %vm4022_vm15, %v2985_v12, %v1257_v4  ;;  %v3241_v12 = vld [vmem:[%s3886_s7 + $0x3c] sm:$0xff] }
  0xbf   : > { %v1659_v13 = vrot.slane %v1658_v30, 4  ;;  %v1695_v32 = vshll.u32 %v4153_v14, 16  ;;  %v1700_v30 = vshrl.u32 %v3072_v7, 16  ;;  %v1703_v34 = vshll.u32 %v3072_v7, 16 }
  0xc0   : > { %v1791_v39 = vpack.c.b16 %v1778_v23, %v1777_v27  ;;  %v1264_v27 = vrot.slane %v3961_v33, 5  ;;  %v1205_v23 = vld [vmem:[%s3886_s7 + $0x3c] sm:$0xe] }
  0xc1   : > { %2991 = vmatmul.msk.bf16.gmra.mxu2 %vm1006_vm11, %v1302_v38  ;;  %v1671_v38 = vshll.u32 %v4130_v28, 16  ;;  %v1664_v43 = vsel %vm3914_vm12, %v1659_v13, %v1663_v40  ;;  %v1697_v59 = vrot.slane %v1695_v32, 5  ;;  %v3248_v13 = vld [vmem:[%s3886_s7 + $0x3c] sm:$0xff]  ;;  %v1705_v33 = vrot.slane %v1703_v34, 5 }
  0xc2   : > { %v1779_v55 = vunpack.c.l.b16 %v1664_v43  ;;  %v1267_v43 = vrot.slane %v3967_v36, 5  ;;  %v4207_v34 = vld [vmem:[%s3886_s7 + $0x5c] sm:$0x1] }
  0xc3   : > { %v1673_v46 = vrot.slane %v1671_v38, 5  ;;  %v1709_v38 = vshll.u32 %v4166_v0, 16 }
  0xc5   : > { %3050 = vmatmul.msk.bf16.gmra.mxu3 %vm1006_vm11, %v3245_v29  ;;  %v1674_v57 = vsel %vm3914_vm12, %v1669_v42, %v1673_v46  ;;  %v1689_v29 = vshrl.u32 %v4138_v58, 16  ;;  %v2986_v46 = vrot.slane %v1205_v23, 9  ;;  %v1711_v61 = vrot.slane %v1709_v38, 5 }
  0xc6   : > { %v1780_v1 = vunpack.c.l.b16 %v1674_v57  ;;  %v1702_v57 = vrot.slane %v1700_v30, 4  ;;  %v1274_v23 = vrot.slane %v3919_v22, 5  ;;  %v1743_v22 = vshll.u32 %v4207_v34, 16 }
  0xc7   : > { %v1691_v10 = vrot.slane %v1689_v29, 4  ;;  %v1265_v29 = vsel %vm4022_vm15, %v2986_v46, %v1264_v27  ;;  %v3242_v46 = vld [vmem:[%s3886_s7 + $0x48] sm:$0xff] }
  0xc8   : > { %v1792_v20 = vpack.c.b16 %v1780_v1, %v1779_v55  ;;  %v1706_v55 = vor.u32 %v1705_v33, %v1702_v57 }
  0xc9   : > { %3083 = vmatmul.msk.bf16.gmra.mxu0 %vm1006_vm11, %v1790_v37  ;;  %v1692_v26 = vor.u32 %v1691_v10, %v1687_v11 }
  0xcb   : > { %2975 = vmatmul.msk.bf16.gmra.mxu1 %vm1006_vm11, %v3238_v18  ;;  %v1260_v18 = vrot.slane %v3903_v17, 5  ;;  %v1293_v17 = vunpack.c.l.b16 %v1258_v52  ;;  %v1693_v8 = vrot.slane %v1692_v26, 4 }
  0xcd   : > { %v1261_v35 = vsel %vm4022_vm15, %v1259_v21, %v1260_v18  ;;  %v4192_v18 = vld [vmem:[%s3886_s7 + $0x58] sm:$0xf] }
  0xce   : > { %v1294_v63 = vunpack.c.l.b16 %v1261_v35  ;;  %v1733_v26 = vshll.u32 %v4192_v18, 16 }
  0xd0   : > { %v1305_v40 = vpack.c.b16 %v1294_v63, %v1293_v17  ;;  %v1737_v17 = vshrl.u32 %v4192_v18, 16  ;;  %v1206_v63 = vld [vmem:[%s3886_s7 + $0x48] sm:$0xe] }
  0xd1   : > { %2992 = vmatmul.msk.bf16.gmra.mxu2 %vm1006_vm11, %v1303_v15  ;;  %v3069_v15 = vld [vmem:[%s3886_s7 + $0x3c] sm:$0xf] }
  0xd2   : > { %v1676_v54 = vshrl.u32 %v3069_v15, 16  ;;  %v1679_v51 = vshll.u32 %v3069_v15, 16  ;;  %v1266_v15 = vrot.slane %v1264_v27, 4  ;;  %v1739_v30 = vrot.slane %v1737_v17, 4 }
  0xd4   : > { %v1678_v9 = vrot.slane %v1676_v54, 4  ;;  %v1681_v37 = vrot.slane %v1679_v51, 5  ;;  %v4180_v51 = vld [vmem:[%s3886_s7 + $0x50] sm:$0x1]  ;;  %v1268_v4 = vsel %vm4022_vm15, %v1266_v15, %v1267_v43 }
  0xd5   : > { %3051 = vmatmul.msk.bf16.gmra.mxu3 %vm1006_vm11, %v3246_v56  ;;  %v1698_v56 = vsel %vm3914_vm12, %v1693_v8, %v1697_v59  ;;  %v1719_v36 = vshll.u32 %v4180_v51, 16  ;;  %v3249_v59 = vld [vmem:[%s3886_s7 + $0x48] sm:$0xff] }
  0xd6   : > { %v1782_v42 = vunpack.c.l.b16 %v1698_v56  ;;  %v2987_v56 = vrot.slane %v1206_v63, 9  ;;  %v4240_v63 = vld [vmem:[%s3886_s7 + $0x68] sm:$0x1] }
  0xd7   : > { %v1721_v21 = vrot.slane %v1719_v36, 5 }
  0xd9   : > { %3084 = vmatmul.msk.bf16.gmra.mxu0 %vm1006_vm11, %v1791_v39  ;;  %v1713_v39 = vshrl.u32 %v4166_v0, 16 }
  0xdb   : > { %2976 = vmatmul.msk.bf16.gmra.mxu1 %vm1006_vm11, %v3239_v47  ;;  %v1715_v54 = vrot.slane %v1713_v39, 4 }
  0xdd   : > { %v1716_v1 = vor.u32 %v1715_v54, %v1711_v61  ;;  %v3078_v54 = vld [vmem:[%s3886_s7 + $0x60] sm:$0xf] }
  0xdf   : > { %v1717_v10 = vrot.slane %v1716_v1, 4  ;;  %v1751_v1 = vshll.u32 %v3078_v54, 16 }
  0xe1   : > { %2993 = vmatmul.msk.bf16.gmra.mxu2 %vm1006_vm11, %v1304_v5  ;;  %v1682_v5 = vor.u32 %v1681_v37, %v1678_v9  ;;  %v1296_v9 = vunpack.c.l.b16 %v1268_v4  ;;  %v3075_v37 = vld [vmem:[%s3886_s7 + $0x54] sm:$0xf]  ;;  %v1722_v35 = vsel %vm3914_vm12, %v1717_v10, %v1721_v21 }
  0xe2   : > { %v1727_v52 = vshll.u32 %v3075_v37, 16 }
  0xe3   : > { %v1683_v2 = vrot.slane %v1682_v5, 4 }
  0xe4   : > { %v1729_v8 = vrot.slane %v1727_v52, 5 }
  0xe5   : > { %3052 = vmatmul.msk.bf16.gmra.mxu3 %vm1006_vm11, %v3247_v62  ;;  %v1688_v41 = vsel %vm3914_vm12, %v1683_v2, %v1687_v11  ;;  %v1295_v62 = vunpack.c.l.b16 %v1265_v29  ;;  %v1707_v11 = vrot.slane %v1706_v55, 4  ;;  %v1748_v55 = vshrl.u32 %v3078_v54, 16 }
  0xe6   : > { %v1781_v47 = vunpack.c.l.b16 %v1688_v41  ;;  %v1735_v41 = vrot.slane %v1733_v26, 5  ;;  %v1753_v26 = vrot.slane %v1751_v1, 5 }
  0xe7   : > { %v1306_v5 = vpack.c.b16 %v1296_v9, %v1295_v62  ;;  %v1712_v32 = vsel %vm3914_vm12, %v1707_v11, %v1711_v61  ;;  %v1745_v61 = vrot.slane %v1743_v22, 5  ;;  %v1278_v9 = vrot.slane %v3978_v48, 5  ;;  %v1207_v11 = vld [vmem:[%s3886_s7 + $0x54] sm:$0xe] }
  0xe8   : > { %v1793_v53 = vpack.c.b16 %v1782_v42, %v1781_v47  ;;  %v1783_v7 = vunpack.c.l.b16 %v1712_v32  ;;  %v1740_v42 = vor.u32 %v1739_v30, %v1735_v41  ;;  %v1281_v48 = vrot.slane %v3981_v49, 5  ;;  %v3243_v30 = vld [vmem:[%s3886_s7 + $0x54] sm:$0xff] }
  0xe9   : > { %3085 = vmatmul.msk.bf16.gmra.mxu0 %vm1006_vm11, %v1792_v20  ;;  %v1724_v20 = vshrl.u32 %v3075_v37, 16 }
  0xea   : > { %v1741_v33 = vrot.slane %v1740_v42, 4 }
  0xeb   : > { %2977 = vmatmul.msk.bf16.gmra.mxu1 %vm1006_vm11, %v3240_v16  ;;  %v1271_v16 = vrot.slane %v3910_v50, 5  ;;  %v1726_v2 = vrot.slane %v1724_v20, 4  ;;  %v3250_v20 = vld [vmem:[%s3886_s7 + $0x54] sm:$0xff] }
  0xed   : > { %v1273_v27 = vrot.slane %v1271_v16, 4  ;;  %v1730_v50 = vor.u32 %v1729_v8, %v1726_v2  ;;  %v1272_v47 = vsel %vm4022_vm15, %v2987_v56, %v1271_v16  ;;  %v1280_v16 = vrot.slane %v1278_v9, 4 }
  0xee   : > { %v1297_v43 = vunpack.c.l.b16 %v1272_v47 }
  0xef   : > { %v1731_v15 = vrot.slane %v1730_v50, 4  ;;  %v1282_v56 = vsel %vm4022_vm15, %v1280_v16, %v1281_v48  ;;  %v3251_v16 = vld [vmem:[%s3886_s7 + $0x60] sm:$0xff] }
  0xf0   : > { %v1300_v22 = vunpack.c.l.b16 %v1282_v56 }
  0xf1   : > { %2994 = vmatmul.msk.bf16.gmra.mxu2 %vm1006_vm11, %v1305_v40  ;;  %v1784_v40 = vunpack.c.l.b16 %v1722_v35  ;;  %v1736_v29 = vsel %vm3914_vm12, %v1731_v15, %v1735_v41  ;;  %v2988_v35 = vrot.slane %v1207_v11, 9 }
  0xf2   : > { %v1785_v10 = vunpack.c.l.b16 %v1736_v29  ;;  %v1926_v29 = vrot.slane %v4027_v3, 5 }
  0xf3   : > { %v1794_v38 = vpack.c.b16 %v1784_v40, %v1783_v7  ;;  %v3174_v40 = vld [vmem:[%s3886_s7 + $0x18] sm:$0xf]  ;;  %v1279_v41 = vsel %vm4022_vm15, %v2988_v35, %v1278_v9 }
  0xf4   : > { %v2274_v47 = vshrl.u32 %v3174_v40, 16  ;;  %v1299_v42 = vunpack.c.l.b16 %v1279_v41 }
  0xf5   : > { %3053 = vmatmul.msk.bf16.gmra.mxu3 %vm1006_vm11, %v3248_v13  ;;  %v1275_v13 = vsel %vm4022_vm15, %v1273_v27, %v1274_v23  ;;  %v1767_v27 = vshll.u32 %v4240_v63, 16  ;;  %v4254_v23 = vld [vmem:[%s3886_s7 + $0x1c] sm:$0xf] }
  0xf6   : > { %v1298_v57 = vunpack.c.l.b16 %v1275_v13  ;;  %v2277_v13 = vshll.u32 %v3174_v40, 16  ;;  %v2283_v15 = vshll.u32 %v4254_v23, 16  ;;  %v2276_v1 = vrot.slane %v2274_v47, 4 }
  0xf7   : > { %v1769_v54 = vrot.slane %v1767_v27, 5  ;;  %v2617_v47 = vrot.slane %v4254_v23, 5 }
  0xf8   : > { %v1307_v4 = vpack.c.b16 %v1298_v57, %v1297_v43  ;;  %v2287_v43 = vshrl.u32 %v4254_v23, 16  ;;  %v2285_v9 = vrot.slane %v2283_v15, 5 }
  0xf9   : > { %3086 = vmatmul.msk.bf16.gmra.mxu0 %vm1006_vm11, %v1793_v53  ;;  %v4221_v53 = vld [vmem:[%s3886_s7 + $0x64] sm:$0xf] }
  0xfa   : > { %v1757_v36 = vshll.u32 %v4221_v53, 16  ;;  %v1761_v37 = vshrl.u32 %v4221_v53, 16 }
  0xfb   : > { %2978 = vmatmul.msk.bf16.gmra.mxu1 %vm1006_vm11, %v3241_v12  ;;  %v1746_v12 = vsel %vm3914_vm12, %v1741_v33, %v1745_v61 }
  0xfc   : > { %v1786_v52 = vunpack.c.l.b16 %v1746_v12  ;;  %v1759_v32 = vrot.slane %v1757_v36, 5  ;;  %v1763_v17 = vrot.slane %v1761_v37, 4  ;;  %v2279_v36 = vrot.slane %v2277_v13, 5 }
  0xfd   : > { %v1308_v12 = vpack.c.b16 %v1300_v22, %v1299_v42  ;;  %v2289_v37 = vrot.slane %v2287_v43, 4  ;;  %v3177_v22 = vld [vmem:[%s3886_s7 + $0x24] sm:$0xf] }
  0xfe   : > { %v1764_v49 = vor.u32 %v1763_v17, %v1759_v32  ;;  %v2280_v35 = vor.u32 %v2279_v36, %v2276_v1  ;;  %v3091_v1 = vld [vmem:[%s3886_s7 + $0x18] sm:$0xe]  ;;  %v2298_v36 = vshrl.u32 %v3177_v22, 16 }
  0xff   : > { %v2290_v17 = vor.u32 %v2289_v37, %v2285_v9 }
 0x100   : > { %v1765_v61 = vrot.slane %v1764_v49, 4  ;;  %v2281_v56 = vrot.slane %v2280_v35, 4 }
 0x101   : > { %2995 = vmatmul.msk.bf16.gmra.mxu2 %vm1006_vm11, %v1306_v5  ;;  %v1750_v5 = vrot.slane %v1748_v55, 4  ;;  %v2291_v27 = vrot.slane %v2290_v17, 4 }
 0x102   : > { %v1770_v3 = vsel %vm3914_vm12, %v1765_v61, %v1769_v54  ;;  %v1930_v54 = vrot.slane %v4058_v60, 5 }
 0x103   : > { %v1754_v7 = vor.u32 %v1753_v26, %v1750_v5 }
 0x105   : > { %3054 = vmatmul.msk.bf16.gmra.mxu3 %vm1006_vm11, %v3249_v59  ;;  %v1795_v59 = vpack.c.b16 %v1786_v52, %v1785_v10  ;;  %v1755_v33 = vrot.slane %v1754_v7, 4 }
 0x106   : > { %v4210_v39 = vpop.f32.mrf.mxu1 }
 0x107   : > { %v1760_v10 = vsel %vm3914_vm12, %v1755_v33, %v1759_v32  ;;  %v1788_v32 = vunpack.c.l.b16 %v1770_v3  ;;  %v2286_v33 = vsel %vm3914_vm12, %v2281_v56, %v2285_v9  ;;  %v1932_v3 = vrot.slane %v1930_v54, 4 }
 0x108   : > { %v1787_v48 = vunpack.c.l.b16 %v1760_v10  ;;  %v3099_v10 = vrot.slane %v3091_v1, 9 }
 0x109   : > { %3087 = vmatmul.msk.bf16.gmra.mxu0 %vm1006_vm11, %v1794_v38  ;;  %v1923_v38 = vrot.slane %v4017_v31, 5 }
 0x10a   : > { %v1796_v49 = vpack.c.b16 %v1788_v32, %v1787_v48  ;;  %v2300_v32 = vrot.slane %v2298_v36, 4 }
 0x10b   : > { %2979 = vmatmul.msk.bf16.gmra.mxu1 %vm1006_vm11, %v3242_v46  ;;  %v3090_v46 = vld [vmem:[%s3886_s7 + $0xc] sm:$0xe]  ;;  %v1925_v55 = vrot.slane %v1923_v38, 4 }
 0x10d   : > { %v1927_v26 = vsel %vm4022_vm15, %v1925_v55, %v1926_v29 }
 0x10e   : > { %v4229_v62 = vpop.f32.mrf.mxu1  ;;  %v1980_v40 = vunpack.c.l.b16 %v1927_v26  ;;  %v2467_v26 = vunpack.c.l.b16 %v2286_v33 }
 0x110   : > { %v4234_v21 = vpop.f32.mrf.mxu2 }
 0x111   : > { %2996 = vmatmul.msk.bf16.gmra.mxu2 %vm1006_vm11, %v1307_v4  ;;  %v3098_v4 = vrot.slane %v3090_v46, 9  ;;  %v4294_v46 = vld [vmem:[%s3886_s7 + $0x28] sm:$0xf] }
 0x112   : > { %v2307_v37 = vshll.u32 %v4294_v46, 16  ;;  %v2311_v9 = vshrl.u32 %v4294_v46, 16 }
 0x113   : > { %v1924_v5 = vsel %vm4022_vm15, %v3098_v4, %v1923_v38  ;;  %v3207_v38 = vld [vmem:[%s3886_s7 + $0x18] sm:$0xe]  ;;  %v2619_v4 = vrot.slane %v2617_v47, 4 }
 0x114   : > { %v4242_v2 = vpop.f32.mrf.mxu0  ;;  %v4244_v8 = vpop.f32.mrf.mxu3  ;;  %v1979_v7 = vunpack.c.l.b16 %v1924_v5  ;;  %v3215_v61 = vrot.slane %v3207_v38, 9  ;;  %v3252_v5 = vld [vmem:[%s3886_s7 + $0x18] sm:$0xff] }
 0x115   : > { %3055 = vmatmul.msk.bf16.gmra.mxu3 %vm1006_vm11, %v3250_v20  ;;  %v3176_v20 = vld [vmem:[%s3886_s7 + $0x20] sm:$0x1] }
 0x116   : > { %v1995_v42 = vpack.c.b16 %v1980_v40, %v1979_v7  ;;  %v2620_v55 = vrot.slane %v3176_v20, 5  ;;  %v2313_v7 = vrot.slane %v2311_v9, 4  ;;  %v4320_v40 = vld [vmem:[%s3886_s7 + $0x2c] sm:$0x1] }
 0x117   : > { %v2317_v33 = vshll.u32 %v4320_v40, 16 }
 0x118   : > { %v4257_v50 = vpop.f32.mrf.mxu1  ;;  %v4264_v57 = vpop.f32.mrf.mxu2 }
 0x119   : > { %3088 = vmatmul.msk.bf16.gmra.mxu0 %vm1006_vm11, %v1795_v59  ;;  %v2293_v59 = vshll.u32 %v3176_v20, 16  ;;  %v2618_v20 = vsel %vm4022_vm15, %v3215_v61, %v2617_v47 }
 0x11a   : > { %v2673_v38 = vunpack.c.l.b16 %v2618_v20 }
 0x11b   : > { %2980 = vmatmul.msk.bf16.gmra.mxu1 %vm1006_vm11, %v3243_v30  ;;  %v2295_v30 = vrot.slane %v2293_v59, 5  ;;  %v2309_v59 = vrot.slane %v2307_v37, 5 }
 0x11c   : > { %v4268_v31 = vpop.f32.mrf.mxu0  ;;  %v4270_v11 = vpop.f32.mrf.mxu3 }
 0x11d   : > { %v2296_v29 = vsel %vm3914_vm12, %v2291_v27, %v2295_v30 }
 0x11e   : > { %v2468_v35 = vunpack.c.l.b16 %v2296_v29 }
 0x120   : > { %v4277_v52 = vpop.f32.mrf.mxu1  ;;  %v2483_v30 = vpack.c.b16 %v2468_v35, %v2467_v26 }
 0x121   : > { %2997 = vmatmul.msk.bf16.gmra.mxu2 %vm1006_vm11, %v1308_v12  ;;  %v2301_v12 = vshll.u32 %v3177_v22, 16 }
 0x123   : > { %v2303_v17 = vrot.slane %v2301_v12, 5  ;;  %v4335_v12 = vld [vmem:[%s3886_s7 + $0x34] sm:$0xf] }
 0x124   : > { %v4285_v41 = vpop.f32.mrf.mxu2 }
 0x125   : > { %3056 = vmatmul.msk.bf16.gmra.mxu3 %vm1006_vm11, %v3251_v16  ;;  %v2621_v16 = vsel %vm4022_vm15, %v2619_v4, %v2620_v55  ;;  %v2304_v22 = vor.u32 %v2303_v17, %v2300_v32  ;;  %v3208_v55 = vld [vmem:[%s3886_s7 + $0x24] sm:$0xe]  ;;  %v1937_v32 = vrot.slane %v4092_v24, 5  ;;  %v2331_v17 = vshll.u32 %v4335_v12, 16 }
 0x126   : > { %v4290_v13 = vpop.f32.mrf.mxu0  ;;  %v2674_v47 = vunpack.c.l.b16 %v2621_v16 }
 0x127   : > { %v2305_v9 = vrot.slane %v2304_v22, 4 }
 0x128   : > { %v4296_v15 = vpop.f32.mrf.mxu3  ;;  %v1160_v43 = vpop.f32.mrf.mxu1  ;;  %v2689_v1 = vpack.c.b16 %v2674_v47, %v2673_v38  ;;  %v2627_v38 = vrot.slane %v4320_v40, 5 }
 0x129   : > { %3089 = vmatmul.msk.bf16.gmra.mxu0 %vm1006_vm11, %v1796_v49  ;;  %v1161_v23 = vadd.f32 %v1160_v43, %v4242_v2  ;;  %v1933_v2 = vrot.slane %v4077_v45, 5  ;;  %v1931_v49 = vsel %vm4022_vm15, %v3099_v10, %v1930_v54  ;;  %v2314_v43 = vor.u32 %v2313_v7, %v2309_v59  ;;  %v3180_v54 = vld [vmem:[%s3886_s7 + $0x30] sm:$0xf] }
 0x12a   : > { %v1981_v61 = vunpack.c.l.b16 %v1931_v49  ;;  %v2322_v26 = vshrl.u32 %v3180_v54, 16  ;;  %v2325_v35 = vshll.u32 %v3180_v54, 16  ;;  %v1940_v7 = vrot.slane %v4110_v6, 5 }
 0x12b   : > { %3107 = vmatmul.msk.bf16.vlgmr.msra.gmra.mxu1 %vm1006_vm11, %v1995_v42  ;;  %v1934_v27 = vsel %vm4022_vm15, %v1932_v3, %v1933_v2  ;;  %v2315_v10 = vrot.slane %v2314_v43, 4  ;;  %v2624_v3 = vrot.slane %v4294_v46, 5  ;;  %v3092_v46 = vld [vmem:[%s3886_s7 + $0x24] sm:$0xe] }
 0x12c   : > { %v4309_v60 = vpop.f32.mrf.mxu2  ;;  %v1982_v29 = vunpack.c.l.b16 %v1934_v27  ;;  %v2310_v27 = vsel %vm3914_vm12, %v2305_v9, %v2309_v59  ;;  %v2324_v47 = vrot.slane %v2322_v26, 4  ;;  %v2327_v22 = vrot.slane %v2325_v35, 5 }
 0x12d   : > { %v2626_v24 = vrot.slane %v2624_v3, 4  ;;  %v2333_v59 = vrot.slane %v2331_v17, 5  ;;  %v2469_v54 = vunpack.c.l.b16 %v2310_v27 }
 0x12e   : > { %v4317_v48 = vpop.f32.mrf.mxu0  ;;  %v1996_v2 = vpack.c.b16 %v1982_v29, %v1981_v61  ;;  %v1939_v61 = vrot.slane %v1937_v32, 4 }
 0x12f   : > { %v2628_v9 = vsel %vm4022_vm15, %v2626_v24, %v2627_v38  ;;  %v3209_v38 = vld [vmem:[%s3886_s7 + $0x30] sm:$0xe] }
 0x130   : > { %v4322_v56 = vpop.f32.mrf.mxu3  ;;  %v1162_v45 = vpop.f32.mrf.mxu1 }
 0x131   : > { %3166 = vmatmul.msk.bf16.vlgmr.msra.gmra.mxu2 %vm1006_vm11, %v3252_v5  ;;  %v1163_v42 = vadd.f32 %v1162_v45, %v4268_v31  ;;  %v2319_v31 = vrot.slane %v2317_v33, 5  ;;  %v3216_v5 = vrot.slane %v3208_v55, 9  ;;  %v3100_v33 = vrot.slane %v3092_v46, 9  ;;  %v3253_v55 = vld [vmem:[%s3886_s7 + $0x24] sm:$0xff] }
 0x133   : > { %v2625_v6 = vsel %vm4022_vm15, %v3216_v5, %v2624_v3  ;;  %v1941_v5 = vsel %vm4022_vm15, %v1939_v61, %v1940_v7 }
 0x134   : > { %v1345_v4 = vpop.f32.mrf.mxu2 }
 0x135   : > { %3199 = vmatmul.msk.bf16.vlgmr.msra.gmra.mxu3 %vm1006_vm11, %v2483_v30  ;;  %v1385_v36 = vadd.f32 %v1345_v4, %v1161_v23  ;;  %v2335_v23 = vshrl.u32 %v4335_v12, 16  ;;  %v2320_v30 = vsel %vm3914_vm12, %v2315_v10, %v2319_v31  ;;  %v2675_v10 = vunpack.c.l.b16 %v2625_v6 }
 0x136   : > { %v1833_v37 = vpop.f32.mrf.mxu0  ;;  %v2328_v31 = vor.u32 %v2327_v22, %v2324_v47  ;;  %v2631_v22 = vrot.slane %v4335_v12, 5 }
 0x137   : > { %v2337_v29 = vrot.slane %v2335_v23, 4 }
 0x138   : > { %v1499_v20 = vpop.f32.mrf.mxu3  ;;  %v1165_v16 = vpop.f32.mrf.mxu1 }
 0x139   : > { %3224 = vmatmul.msk.bf16.vlgmr.msra.gmra.mxu0 %vm1006_vm11, %v2689_v1  ;;  %v1539_v45 = vadd.f32 %v1499_v20, %v1385_v36  ;;  %v1166_v49 = vadd.f32 %v1165_v16, %v4290_v13  ;;  %v2470_v1 = vunpack.c.l.b16 %v2320_v30  ;;  %v4357_v36 = vld [vmem:[%s3886_s7 + $0x38] sm:$0x1]  ;;  %v2676_v16 = vunpack.c.l.b16 %v2628_v9 }
 0x13a   : > { %v2341_v26 = vshll.u32 %v4357_v36, 16 }
 0x13b   : > { %3108 = vmatmul.msk.bf16.gmra.mxu1 %vm1006_vm11, %v1996_v2  ;;  %v4353_v13 = vadd.f32 %v1833_v37, %v1539_v45  ;;  %v1938_v2 = vsel %vm4022_vm15, %v3100_v33, %v1937_v32  ;;  %v2484_v20 = vpack.c.b16 %v2470_v1, %v2469_v54  ;;  %v1984_v45 = vunpack.c.l.b16 %v1941_v5  ;;  %v4375_v33 = vld [vmem:[%s3886_s7 + $0x40] sm:$0xf] }
 0x13c   : > { %v1347_v43 = vpop.f32.mrf.mxu2  ;;  %v1983_v23 = vunpack.c.l.b16 %v1938_v2  ;;  %v2329_v32 = vrot.slane %v2328_v31, 4  ;;  %v2343_v30 = vrot.slane %v2341_v26, 5  ;;  %v2690_v7 = vpack.c.b16 %v2676_v16, %v2675_v10  ;;  %v3254_v16 = vld [vmem:[%s3886_s7 + $0x30] sm:$0xff] }
 0x13d   : > { %v1386_v4 = vadd.f32 %v1347_v43, %v1163_v42  ;;  %v2338_v42 = vor.u32 %v2337_v29, %v2333_v59  ;;  %v3183_v43 = vld [vmem:[%s3886_s7 + $0x3c] sm:$0xf]  ;;  %v1944_v54 = vrot.slane %v4118_v19, 5  ;;  %v2633_v31 = vrot.slane %v2631_v22, 4 }
 0x13e   : > { %v1835_v40 = vpop.f32.mrf.mxu0  ;;  %v2346_v9 = vshrl.u32 %v3183_v43, 16  ;;  %v2349_v10 = vshll.u32 %v3183_v43, 16  ;;  %v1947_v2 = vrot.slane %v4130_v28, 5 }
 0x13f   : > { %v2339_v27 = vrot.slane %v2338_v42, 4 }
 0x140   : > { %v1501_v3 = vpop.f32.mrf.mxu3  ;;  %v1167_v37 = vpop.f32.mrf.mxu1 }
 0x141   : > { %v1540_v35 = vadd.f32 %v1501_v3, %v1386_v4  ;;  %3167 = vmatmul.msk.bf16.gmra.mxu2 %vm1006_vm11, %v3253_v55  ;;  %v1168_v17 = vadd.f32 %v1167_v37, %v4317_v48  ;;  %v1997_v48 = vpack.c.b16 %v1984_v45, %v1983_v23  ;;  %v2334_v4 = vsel %vm3914_vm12, %v2329_v32, %v2333_v59 }
 0x142   : > { %v2344_v55 = vsel %vm3914_vm12, %v2339_v27, %v2343_v30  ;;  %v2634_v3 = vrot.slane %v4357_v36, 5  ;;  %v2355_v59 = vshll.u32 %v4375_v33, 16  ;;  %v2359_v37 = vshrl.u32 %v4375_v33, 16  ;;  %v3185_v30 = vld [vmem:[%s3886_s7 + $0x44] sm:$0x1] }
 0x143   : > { %v4370_v6 = vadd.f32 %v1835_v40, %v1540_v35  ;;  %v3093_v40 = vld [vmem:[%s3886_s7 + $0x30] sm:$0xe]  ;;  %v2472_v42 = vunpack.c.l.b16 %v2344_v55  ;;  %v1946_v35 = vrot.slane %v1944_v54, 4  ;;  %v2348_v23 = vrot.slane %v2346_v9, 4  ;;  %v3210_v9 = vld [vmem:[%s3886_s7 + $0x3c] sm:$0xe] }
 0x144   : > { %v1350_v46 = vpop.f32.mrf.mxu2  ;;  %v3101_v26 = vrot.slane %v3093_v40, 9  ;;  %v2351_v45 = vrot.slane %v2349_v10, 5  ;;  %v2635_v28 = vsel %vm4022_vm15, %v2633_v31, %v2634_v3  ;;  %v2357_v32 = vrot.slane %v2355_v59, 5 }
 0x145   : > { %3200 = vmatmul.msk.bf16.gmra.mxu3 %vm1006_vm11, %v2484_v20  ;;  %v1387_v24 = vadd.f32 %v1350_v46, %v1166_v49  ;;  %v3217_v49 = vrot.slane %v3209_v38, 9  ;;  %v2361_v27 = vrot.slane %v2359_v37, 4  ;;  %v2365_v55 = vshll.u32 %v3185_v30, 16  ;;  %v4409_v37 = vld [vmem:[%s3886_s7 + $0x4c] sm:$0xf] }
 0x146   : > { %v1838_v47 = vpop.f32.mrf.mxu0 }
 0x147   : > { %v2632_v36 = vsel %vm4022_vm15, %v3217_v49, %v2631_v22  ;;  %v1948_v22 = vsel %vm4022_vm15, %v1946_v35, %v1947_v2  ;;  %v2638_v49 = vrot.slane %v4375_v33, 5  ;;  %v2641_v35 = vrot.slane %v3185_v30, 5 }
 0x148   : > { %v1504_v61 = vpop.f32.mrf.mxu3  ;;  %v1170_v29 = vpop.f32.mrf.mxu1  ;;  %v2677_v38 = vunpack.c.l.b16 %v2632_v36  ;;  %v1986_v40 = vunpack.c.l.b16 %v1948_v22 }
 0x149   : > { %3225 = vmatmul.msk.bf16.gmra.mxu0 %vm1006_vm11, %v2690_v7  ;;  %v1541_v1 = vadd.f32 %v1504_v61, %v1387_v24  ;;  %v1171_v12 = vadd.f32 %v1170_v29, %v4210_v39  ;;  %v2471_v39 = vunpack.c.l.b16 %v2334_v4  ;;  %v2352_v29 = vor.u32 %v2351_v45, %v2348_v23 }
 0x14a   : > { %v2362_v4 = vor.u32 %v2361_v27, %v2357_v32  ;;  %v2640_v33 = vrot.slane %v2638_v49, 4  ;;  %v1951_v45 = vrot.slane %v4138_v58, 5 }
 0x14b   : > { %3109 = vmatmul.msk.bf16.gmra.mxu1 %vm1006_vm11, %v1997_v48  ;;  %v4390_v19 = vadd.f32 %v1838_v47, %v1541_v1  ;;  %v2485_v24 = vpack.c.b16 %v2472_v42, %v2471_v39  ;;  %v2678_v48 = vunpack.c.l.b16 %v2635_v28  ;;  %v2353_v59 = vrot.slane %v2352_v29, 4 }
 0x14c   : > { %v1352_v5 = vpop.f32.mrf.mxu2  ;;  %v2367_v39 = vrot.slane %v2365_v55, 5  ;;  %v3218_v42 = vrot.slane %v3210_v9, 9  ;;  %v2383_v28 = vshrl.u32 %v4409_v37, 16  ;;  %v3255_v55 = vld [vmem:[%s3886_s7 + $0x3c] sm:$0xff]  ;;  %v4435_v9 = vld [vmem:[%s3886_s7 + $0x50] sm:$0x1] }
 0x14d   : > { %v1388_v20 = vadd.f32 %v1352_v5, %v1168_v17  ;;  %v1945_v17 = vsel %vm4022_vm15, %v3101_v26, %v1944_v54  ;;  %v3186_v54 = vld [vmem:[%s3886_s7 + $0x48] sm:$0xf]  ;;  %v2691_v31 = vpack.c.b16 %v2678_v48, %v2677_v38  ;;  %v2363_v5 = vrot.slane %v2362_v4, 4 }
 0x14e   : > { %v1840_v46 = vpop.f32.mrf.mxu0  ;;  %v1985_v1 = vunpack.c.l.b16 %v1945_v17  ;;  %v2358_v30 = vsel %vm3914_vm12, %v2353_v59, %v2357_v32  ;;  %v2639_v58 = vsel %vm4022_vm15, %v3218_v42, %v2638_v49  ;;  %v1953_v48 = vrot.slane %v1951_v45, 4 }
 0x14f   : > { %v2368_v38 = vsel %vm3914_vm12, %v2363_v5, %v2367_v39  ;;  %v2385_v29 = vrot.slane %v2383_v28, 4 }
 0x150   : > { %v1506_v7 = vpop.f32.mrf.mxu3  ;;  %v1172_v47 = vpop.f32.mrf.mxu1  ;;  %v1998_v26 = vpack.c.b16 %v1986_v40, %v1985_v1  ;;  %v2473_v1 = vunpack.c.l.b16 %v2358_v30  ;;  %v2474_v49 = vunpack.c.l.b16 %v2368_v38  ;;  %v2645_v30 = vrot.slane %v4409_v37, 5 }
 0x151   : > { %v1542_v43 = vadd.f32 %v1506_v7, %v1388_v20  ;;  %3168 = vmatmul.msk.bf16.gmra.mxu2 %vm1006_vm11, %v3254_v16  ;;  %v1173_v61 = vadd.f32 %v1172_v47, %v4229_v62  ;;  %v2370_v20 = vshrl.u32 %v3186_v54, 16  ;;  %v2373_v16 = vshll.u32 %v3186_v54, 16  ;;  %v3094_v7 = vld [vmem:[%s3886_s7 + $0x3c] sm:$0xe] }
 0x152   : > { %v2642_v47 = vsel %vm4022_vm15, %v2640_v33, %v2641_v35  ;;  %v2486_v42 = vpack.c.b16 %v2474_v49, %v2473_v1  ;;  %v2647_v1 = vrot.slane %v2645_v30, 4  ;;  %v2648_v49 = vrot.slane %v4435_v9, 5 }
 0x153   : > { %v4411_v2 = vadd.f32 %v1840_v46, %v1542_v43  ;;  %v2375_v17 = vrot.slane %v2373_v16, 5  ;;  %v3102_v43 = vrot.slane %v3094_v7, 9  ;;  %v2680_v54 = vunpack.c.l.b16 %v2642_v47  ;;  %v3189_v16 = vld [vmem:[%s3886_s7 + $0x54] sm:$0xf] }
 0x154   : > { %v1355_v10 = vpop.f32.mrf.mxu2  ;;  %v2397_v47 = vshll.u32 %v3189_v16, 16 }
 0x155   : > { %3201 = vmatmul.msk.bf16.gmra.mxu3 %vm1006_vm11, %v2485_v24  ;;  %v1389_v3 = vadd.f32 %v1355_v10, %v1171_v12  ;;  %v2379_v12 = vshll.u32 %v4409_v37, 16  ;;  %v1954_v24 = vrot.slane %v4153_v14, 5  ;;  %v2679_v10 = vunpack.c.l.b16 %v2639_v58 }
 0x156   : > { %v1843_v62 = vpop.f32.mrf.mxu0  ;;  %v1952_v59 = vsel %vm4022_vm15, %v3102_v43, %v1951_v45  ;;  %v2394_v58 = vshrl.u32 %v3189_v16, 16  ;;  %v1958_v37 = vrot.slane %v4166_v0, 5  ;;  %v1961_v0 = vrot.slane %v4180_v51, 5 }
 0x157   : > { %v4431_v32 = vrot.slane %v2379_v12, 5  ;;  %v1987_v35 = vunpack.c.l.b16 %v1952_v59  ;;  %v2649_v16 = vsel %vm4022_vm15, %v2647_v1, %v2648_v49  ;;  %v3192_v1 = vld [vmem:[%s3886_s7 + $0x60] sm:$0xf] }
 0x158   : > { %v1509_v36 = vpop.f32.mrf.mxu3  ;;  %v1175_v23 = vpop.f32.mrf.mxu1 }
 0x159   : > { %3226 = vmatmul.msk.bf16.gmra.mxu0 %vm1006_vm11, %v2691_v31  ;;  %v1543_v46 = vadd.f32 %v1509_v36, %v1389_v3  ;;  %v1176_v27 = vadd.f32 %v1175_v23, %v4257_v50  ;;  %v2372_v50 = vrot.slane %v2370_v20, 4  ;;  %v4447_v36 = vld [vmem:[%s3886_s7 + $0x58] sm:$0xf]  ;;  %v2692_v23 = vpack.c.b16 %v2680_v54, %v2679_v10 }
 0x15a   : > { %v2396_v10 = vrot.slane %v2394_v58, 4  ;;  %v2399_v54 = vrot.slane %v2397_v47, 5 }
 0x15b   : > { %3110 = vmatmul.msk.bf16.gmra.mxu1 %vm1006_vm11, %v1998_v26  ;;  %v4429_v22 = vadd.f32 %v1843_v62, %v1543_v46  ;;  %v1955_v62 = vsel %vm4022_vm15, %v1953_v48, %v1954_v24  ;;  %v2376_v5 = vor.u32 %v2375_v17, %v2372_v50  ;;  %v2389_v26 = vshll.u32 %v4435_v9, 16  ;;  %v3211_v24 = vld [vmem:[%s3886_s7 + $0x48] sm:$0xe] }
 0x15c   : > { %v1357_v14 = vpop.f32.mrf.mxu2  ;;  %v1988_v20 = vunpack.c.l.b16 %v1955_v62  ;;  %v2403_v50 = vshll.u32 %v4447_v36, 16  ;;  %v2407_v17 = vshrl.u32 %v4447_v36, 16 }
 0x15d   : > { %v1390_v4 = vadd.f32 %v1357_v14, %v1173_v61  ;;  %v2386_v61 = vor.u32 %v2385_v29, %v4431_v32  ;;  %v2377_v12 = vrot.slane %v2376_v5, 4  ;;  %v2391_v7 = vrot.slane %v2389_v26, 5 }
 0x15e   : > { %v1845_v40 = vpop.f32.mrf.mxu0  ;;  %v1999_v14 = vpack.c.b16 %v1988_v20, %v1987_v35  ;;  %v3219_v29 = vrot.slane %v3211_v24, 9  ;;  %v1960_v5 = vrot.slane %v1958_v37, 4 }
 0x15f   : > { %v2387_v28 = vrot.slane %v2386_v61, 4  ;;  %v4470_v61 = vld [vmem:[%s3886_s7 + $0x5c] sm:$0x1] }
 0x160   : > { %v1511_v31 = vpop.f32.mrf.mxu3  ;;  %v1177_v3 = vpop.f32.mrf.mxu1  ;;  %v2646_v20 = vsel %vm4022_vm15, %v3219_v29, %v2645_v30  ;;  %v2413_v51 = vshll.u32 %v4470_v61, 16  ;;  %v3212_v29 = vld [vmem:[%s3886_s7 + $0x54] sm:$0xe] }
 0x161   : > { %v1544_v39 = vadd.f32 %v1511_v31, %v1390_v4  ;;  %3169 = vmatmul.msk.bf16.gmra.mxu2 %vm1006_vm11, %v3255_v55  ;;  %v1178_v33 = vadd.f32 %v1177_v3, %v4277_v52  ;;  %v2392_v55 = vsel %vm3914_vm12, %v2387_v28, %v2391_v7  ;;  %v2405_v31 = vrot.slane %v2403_v50, 5 }
 0x162   : > { %v2409_v3 = vrot.slane %v2407_v17, 4  ;;  %v2476_v9 = vunpack.c.l.b16 %v2392_v55  ;;  %v2681_v30 = vunpack.c.l.b16 %v2646_v20  ;;  %v1968_v20 = vrot.slane %v4207_v34, 5 }
 0x163   : > { %v4452_v38 = vadd.f32 %v1845_v40, %v1544_v39  ;;  %v3095_v40 = vld [vmem:[%s3886_s7 + $0x48] sm:$0xe] }
 0x164   : > { %v1360_v45 = vpop.f32.mrf.mxu2  ;;  %v3103_v62 = vrot.slane %v3095_v40, 9 }
 0x165   : > { %3202 = vmatmul.msk.bf16.gmra.mxu3 %vm1006_vm11, %v2486_v42  ;;  %v1391_v46 = vadd.f32 %v1360_v45, %v1176_v27  ;;  %v2382_v27 = vsel %vm3914_vm12, %v2377_v12, %v4431_v32  ;;  %v3256_v42 = vld [vmem:[%s3886_s7 + $0x48] sm:$0xff]  ;;  %v2410_v45 = vor.u32 %v2409_v3, %v2405_v31  ;;  %v3220_v3 = vrot.slane %v3212_v29, 9 }
 0x166   : > { %v1848_v52 = vpop.f32.mrf.mxu0  ;;  %v2475_v26 = vunpack.c.l.b16 %v2382_v27 }
 0x167   : > { %v2411_v47 = vrot.slane %v2410_v45, 4 }
 0x168   : > { %v1514_v43 = vpop.f32.mrf.mxu3  ;;  %v1180_v48 = vpop.f32.mrf.mxu1  ;;  %v2487_v24 = vpack.c.b16 %v2476_v9, %v2475_v26  ;;  %v2655_v26 = vrot.slane %v4470_v61, 5  ;;  %v3096_v9 = vld [vmem:[%s3886_s7 + $0x54] sm:$0xe] }
 0x169   : > { %3227 = vmatmul.msk.bf16.gmra.mxu0 %vm1006_vm11, %v2692_v23  ;;  %v1545_v4 = vadd.f32 %v1514_v43, %v1391_v46  ;;  %v2400_v23 = vor.u32 %v2399_v54, %v2396_v10  ;;  %v1962_v46 = vsel %vm4022_vm15, %v1960_v5, %v1961_v0  ;;  %v1181_v50 = vadd.f32 %v1180_v48, %v4234_v21  ;;  %v4491_v10 = vld [vmem:[%s3886_s7 + $0x64] sm:$0xf] }
 0x16a   : > { %v2415_v43 = vrot.slane %v2413_v51, 5  ;;  %v2418_v5 = vshrl.u32 %v3192_v1, 16 }
 0x16b   : > { %3111 = vmatmul.msk.bf16.gmra.mxu1 %vm1006_vm11, %v1999_v14  ;;  %v4466_v32 = vadd.f32 %v1848_v52, %v1545_v4  ;;  %v2682_v52 = vunpack.c.l.b16 %v2649_v16  ;;  %v2401_v58 = vrot.slane %v2400_v23, 4  ;;  %v1990_v14 = vunpack.c.l.b16 %v1962_v46 }
 0x16c   : > { %v1362_v59 = vpop.f32.mrf.mxu2  ;;  %v2416_v48 = vsel %vm3914_vm12, %v2411_v47, %v2415_v43  ;;  %v2420_v46 = vrot.slane %v2418_v5, 4 }
 0x16d   : > { %v1392_v39 = vadd.f32 %v1362_v59, %v1178_v33  ;;  %v1959_v33 = vsel %vm4022_vm15, %v3103_v62, %v1958_v37  ;;  %v2652_v37 = vrot.slane %v4447_v36, 5  ;;  %v2693_v4 = vpack.c.b16 %v2682_v52, %v2681_v30  ;;  %v3257_v30 = vld [vmem:[%s3886_s7 + $0x54] sm:$0xff] }
 0x16e   : > { %v1850_v35 = vpop.f32.mrf.mxu0  ;;  %v1989_v17 = vunpack.c.l.b16 %v1959_v33  ;;  %v2406_v21 = vsel %vm3914_vm12, %v2401_v58, %v2405_v31  ;;  %v1965_v62 = vrot.slane %v4192_v18, 5  ;;  %v2427_v31 = vshll.u32 %v4491_v10, 16  ;;  %v3194_v58 = vld [vmem:[%s3886_s7 + $0x68] sm:$0x1] }
 0x16f   : > { %v2654_v59 = vrot.slane %v2652_v37, 4  ;;  %v2477_v16 = vunpack.c.l.b16 %v2406_v21  ;;  %v2478_v18 = vunpack.c.l.b16 %v2416_v48  ;;  %v2653_v45 = vsel %vm4022_vm15, %v3220_v3, %v2652_v37 }
 0x170   : > { %v1516_v12 = vpop.f32.mrf.mxu3  ;;  %v1182_v28 = vpop.f32.mrf.mxu1  ;;  %v2000_v54 = vpack.c.b16 %v1990_v14, %v1989_v17  ;;  %v1967_v33 = vrot.slane %v1965_v62, 4  ;;  %v2683_v47 = vunpack.c.l.b16 %v2653_v45 }
 0x171   : > { %v1546_v7 = vadd.f32 %v1516_v12, %v1392_v39  ;;  %3170 = vmatmul.msk.bf16.gmra.mxu2 %vm1006_vm11, %v3256_v42  ;;  %v2421_v39 = vshll.u32 %v3192_v1, 16  ;;  %v1183_v23 = vadd.f32 %v1182_v28, %v4264_v57  ;;  %v3104_v12 = vrot.slane %v3096_v9, 9 }
 0x172   : > { %v2656_v34 = vsel %vm4022_vm15, %v2654_v59, %v2655_v26  ;;  %v2429_v57 = vrot.slane %v2427_v31, 5  ;;  %v2437_v1 = vshll.u32 %v3194_v58, 16  ;;  %v2659_v9 = vrot.slane %v4491_v10, 5  ;;  %v3195_v31 = vld [vmem:[%s3886_s7 + $0x6c] sm:$0xf] }
 0x173   : > { %v4488_v49 = vadd.f32 %v1850_v35, %v1546_v7  ;;  %v2431_v35 = vshrl.u32 %v4491_v10, 16  ;;  %v2423_v7 = vrot.slane %v2421_v39, 5  ;;  %v2684_v17 = vunpack.c.l.b16 %v2656_v34  ;;  %v3213_v39 = vld [vmem:[%s3886_s7 + $0x60] sm:$0xe] }
 0x174   : > { %v1365_v27 = vpop.f32.mrf.mxu2  ;;  %v1966_v43 = vsel %vm4022_vm15, %v3104_v12, %v1965_v62  ;;  %v2439_v5 = vrot.slane %v2437_v1, 5  ;;  %v3097_v12 = vld [vmem:[%s3886_s7 + $0x60] sm:$0xe]  ;;  %v2442_v10 = vshrl.u32 %v3195_v31, 16  ;;  %v1975_v34 = vrot.slane %v4240_v63, 5 }
 0x175   : > { %3203 = vmatmul.msk.bf16.gmra.mxu3 %vm1006_vm11, %v2487_v24  ;;  %v1393_v55 = vadd.f32 %v1365_v27, %v1181_v50  ;;  %v2433_v28 = vrot.slane %v2431_v35, 4  ;;  %v1969_v27 = vsel %vm4022_vm15, %v1967_v33, %v1968_v20  ;;  %v2424_v29 = vor.u32 %v2423_v7, %v2420_v46 }
 0x176   : > { %v1853_v40 = vpop.f32.mrf.mxu0  ;;  %v1992_v21 = vunpack.c.l.b16 %v1969_v27  ;;  %v2694_v48 = vpack.c.b16 %v2684_v17, %v2683_v47  ;;  %v2445_v33 = vshll.u32 %v3195_v31, 16  ;;  %v2661_v46 = vrot.slane %v2659_v9, 4 }
 0x177   : > { %v2662_v7 = vrot.slane %v3194_v58, 5  ;;  %v3258_v58 = vld [vmem:[%s3886_s7 + $0x60] sm:$0xff] }
 0x178   : > { %v1519_v36 = vpop.f32.mrf.mxu3  ;;  %v1185_v0 = vpop.f32.mrf.mxu1 }
 0x179   : > { %3228 = vmatmul.msk.bf16.gmra.mxu0 %vm1006_vm11, %v2693_v4  ;;  %v1547_v42 = vadd.f32 %v1519_v36, %v1393_v55  ;;  %v2488_v4 = vpack.c.b16 %v2478_v18, %v2477_v16  ;;  %v2434_v55 = vor.u32 %v2433_v28, %v2429_v57  ;;  %v2425_v36 = vrot.slane %v2424_v29, 4 }
 0x17a   : > { %v1972_v18 = vrot.slane %v4221_v53, 5  ;;  %v2444_v29 = vrot.slane %v2442_v10, 4 }
 0x17b   : > { %3112 = vmatmul.msk.bf16.gmra.mxu1 %vm1006_vm11, %v2000_v54  ;;  %v4508_v51 = vadd.f32 %v1853_v40, %v1547_v42  ;;  %v1186_v40 = vadd.f32 %v1185_v0, %v4285_v41  ;;  %v1991_v54 = vunpack.c.l.b16 %v1966_v43  ;;  %v2435_v62 = vrot.slane %v2434_v55, 4  ;;  %v4527_v0 = vld [vmem:[%s3886_s7 + $0x70] sm:$0xf]  ;;  %v3197_v55 = vld [vmem:[%s3886_s7 + $0x74] sm:$0x1] }
 0x17c   : > { %v1367_v61 = vpop.f32.mrf.mxu2  ;;  %v2430_v16 = vsel %vm3914_vm12, %v2425_v36, %v2429_v57  ;;  %v1974_v17 = vrot.slane %v1972_v18, 4  ;;  %v2666_v10 = vrot.slane %v4527_v0, 5 }
 0x17d   : > { %v1394_v24 = vadd.f32 %v1367_v61, %v1183_v23  ;;  %v2001_v41 = vpack.c.b16 %v1992_v21, %v1991_v54  ;;  %v3221_v23 = vrot.slane %v3213_v39, 9  ;;  %v2440_v61 = vsel %vm3914_vm12, %v2435_v62, %v2439_v5 }
 0x17e   : > { %v1855_v52 = vpop.f32.mrf.mxu0  ;;  %v2480_v47 = vunpack.c.l.b16 %v2440_v61  ;;  %v2461_v39 = vshll.u32 %v3197_v55, 16 }
 0x17f   : > { %v2660_v27 = vsel %vm4022_vm15, %v3221_v23, %v2659_v9 }
 0x180   : > { %v1521_v50 = vpop.f32.mrf.mxu3  ;;  %v1187_v14 = vpop.f32.mrf.mxu1 }
 0x181   : > { %v1548_v37 = vadd.f32 %v1521_v50, %v1394_v24  ;;  %3171 = vmatmul.msk.bf16.gmra.mxu2 %vm1006_vm11, %v3257_v30  ;;  %v2451_v24 = vshll.u32 %v4527_v0, 16  ;;  %v2455_v30 = vshrl.u32 %v4527_v0, 16  ;;  %v1188_v53 = vadd.f32 %v1187_v14, %v4309_v60 }
 0x182   : > { %v3105_v50 = vrot.slane %v3097_v12, 9  ;;  %v2663_v60 = vsel %vm4022_vm15, %v2661_v46, %v2662_v7  ;;  %v2463_v12 = vrot.slane %v2461_v39, 5  ;;  %v3214_v46 = vld [vmem:[%s3886_s7 + $0x6c] sm:$0xe] }
 0x183   : > { %v4522_v42 = vadd.f32 %v1855_v52, %v1548_v37  ;;  %v2479_v52 = vunpack.c.l.b16 %v2430_v16  ;;  %v2447_v37 = vrot.slane %v2445_v33, 5  ;;  %v2453_v14 = vrot.slane %v2451_v24, 5 }
 0x184   : > { %v1370_v3 = vpop.f32.mrf.mxu2  ;;  %v1973_v21 = vsel %vm4022_vm15, %v3105_v50, %v1972_v18 }
 0x185   : > { %3204 = vmatmul.msk.bf16.gmra.mxu3 %vm1006_vm11, %v2488_v4  ;;  %v1395_v59 = vadd.f32 %v1370_v3, %v1186_v40  ;;  %v2457_v4 = vrot.slane %v2455_v30, 4  ;;  %v2685_v40 = vunpack.c.l.b16 %v2660_v27  ;;  %v2489_v36 = vpack.c.b16 %v2480_v47, %v2479_v52 }
 0x186   : > { %v1858_v26 = vpop.f32.mrf.mxu0  ;;  %v2448_v62 = vor.u32 %v2447_v37, %v2444_v29  ;;  %v1993_v9 = vunpack.c.l.b16 %v1973_v21 }
 0x187   : > { %v2458_v5 = vor.u32 %v2457_v4, %v2453_v14 }
 0x188   : > { %v1524_v35 = vpop.f32.mrf.mxu3  ;;  %v1190_v20 = vpop.f32.mrf.mxu1  ;;  %v2449_v18 = vrot.slane %v2448_v62, 4 }
 0x189   : > { %3229 = vmatmul.msk.bf16.gmra.mxu0 %vm1006_vm11, %v2694_v48  ;;  %v1549_v45 = vadd.f32 %v1524_v35, %v1395_v59  ;;  %v1976_v48 = vsel %vm4022_vm15, %v1974_v17, %v1975_v34  ;;  %v2686_v59 = vunpack.c.l.b16 %v2663_v60  ;;  %v2459_v61 = vrot.slane %v2458_v5, 4  ;;  %v3259_v17 = vld [vmem:[%s3886_s7 + $0x6c] sm:$0xff] }
 0x18a   : > { %v1994_v31 = vunpack.c.l.b16 %v1976_v48  ;;  %v2454_v24 = vsel %vm3914_vm12, %v2449_v18, %v2453_v14  ;;  %v3222_v34 = vrot.slane %v3214_v46, 9 }
 0x18b   : > { %3113 = vmatmul.msk.bf16.gmra.mxu1 %vm1006_vm11, %v2001_v41  ;;  %v4541_v57 = vadd.f32 %v1858_v26, %v1549_v45  ;;  %v1191_v26 = vadd.f32 %v1190_v20, %v4244_v8  ;;  %v2695_v16 = vpack.c.b16 %v2686_v59, %v2685_v40  ;;  %v2464_v30 = vsel %vm3914_vm12, %v2459_v61, %v2463_v12 }
 0x18c   : > { %v1372_v28 = vpop.f32.mrf.mxu2  ;;  %v2002_v33 = vpack.c.b16 %v1994_v31, %v1993_v9  ;;  %v2667_v29 = vsel %vm4022_vm15, %v3222_v34, %v2666_v10 }
 0x18d   : > { %v1396_v43 = vadd.f32 %v1372_v28, %v1188_v53  ;;  %v2668_v53 = vrot.slane %v2666_v10, 4  ;;  %v2669_v28 = vrot.slane %v3197_v55, 5  ;;  %v2687_v14 = vunpack.c.l.b16 %v2667_v29  ;;  %v4591_v10 = vld [vmem:[%s4678_s2] ss:$0 sm:$0xff] }
 0x18e   : > { %v1860_v63 = vpop.f32.mrf.mxu0 }
 0x18f   : > { %v2670_v44 = vsel %vm4022_vm15, %v2668_v53, %v2669_v28 }
 0x190   : > { %v1526_v1 = vpop.f32.mrf.mxu3  ;;  %v1192_v54 = vpop.f32.mrf.mxu1  ;;  %v2688_v4 = vunpack.c.l.b16 %v2670_v44 }
 0x191   : > { %v1550_v3 = vadd.f32 %v1526_v1, %v1396_v43  ;;  %3172 = vmatmul.msk.bf16.gmra.mxu2 %vm1006_vm11, %v3258_v58  ;;  %v1193_v52 = vadd.f32 %v1192_v54, %v4270_v11  ;;  %v2481_v43 = vunpack.c.l.b16 %v2454_v24  ;;  %v2482_v58 = vunpack.c.l.b16 %v2464_v30 }
 0x192   : > { %v2696_v54 = vpack.c.b16 %v2688_v4, %v2687_v14 }
 0x193   : > { %v4555_v41 = vadd.f32 %v1860_v63, %v1550_v3  ;;  %v2490_v11 = vpack.c.b16 %v2482_v58, %v2481_v43 }
 0x194   : > { %v1375_v35 = vpop.f32.mrf.mxu2 }
 0x195   : > { %3205 = vmatmul.msk.bf16.gmra.mxu3 %vm1006_vm11, %v2489_v36  ;;  %v1397_v23 = vadd.f32 %v1375_v35, %v1191_v26 }
 0x196   : > { %v1863_v45 = vpop.f32.mrf.mxu0 }
 0x198   : > { %v1529_v7 = vpop.f32.mrf.mxu3  ;;  %v1195_v8 = vpop.f32.mrf.mxu1 }
 0x199   : > { %3230 = vmatmul.msk.bf16.gmra.mxu0 %vm1006_vm11, %v2695_v16  ;;  %v1551_v20 = vadd.f32 %v1529_v7, %v1397_v23  ;;  %v1196_v55 = vadd.f32 %v1195_v8, %v4296_v15 }
 0x19b   : > { %3114 = vmatmul.msk.bf16.gmra.mxu1 %vm1006_vm11, %v2002_v33  ;;  %v4567_v0 = vadd.f32 %v1863_v45, %v1551_v20 }
 0x19c   : > { %v1377_v47 = vpop.f32.mrf.mxu2 }
 0x19d   : > { %v1398_v50 = vadd.f32 %v1377_v47, %v1193_v52 }
 0x19e   : > { %v1865_v27 = vpop.f32.mrf.mxu0 }
 0x1a0   : > { %v1531_v37 = vpop.f32.mrf.mxu3  ;;  %v1197_v63 = vpop.f32.mrf.mxu1 }
 0x1a1   : > { %v1552_v60 = vadd.f32 %v1531_v37, %v1398_v50  ;;  %3173 = vmatmul.msk.bf16.gmra.mxu2 %vm1006_vm11, %v3259_v17  ;;  %v1198_v59 = vadd.f32 %v1197_v63, %v4322_v56 }
 0x1a3   : > { %v4576_v1 = vadd.f32 %v1865_v27, %v1552_v60 }
 0x1a4   : > { %v1380_v40 = vpop.f32.mrf.mxu2 }
 0x1a5   : > { %3206 = vmatmul.msk.bf16.gmra.mxu3 %vm1006_vm11, %v2490_v11  ;;  %v1399_v21 = vadd.f32 %v1380_v40, %v1196_v55 }
 0x1a6   : > { %v1868_v25 = vpop.f32.mrf.mxu0 }
 0x1a8   : > { %v1534_v48 = vpop.f32.mrf.mxu3  ;;  %v2039_v3 = vpop.f32.mrf.mxu1 }
 0x1a9   : > { %3231 = vmatmul.msk.bf16.gmra.mxu0 %vm1006_vm11, %v2696_v54  ;;  %v1553_v36 = vadd.f32 %v1534_v48, %v1399_v21  ;;  %v2079_v35 = vadd.f32 %v2039_v3, %v4353_v13 }
 0x1ab   : > { %v4582_v62 = vadd.f32 %v1868_v25, %v1553_v36 }
 0x1ac   : > { %v1382_v15 = vpop.f32.mrf.mxu2 }
 0x1ad   : > { %v1400_v5 = vadd.f32 %v1382_v15, %v1198_v59 }
 0x1ae   : > { %v1870_v39 = vpop.f32.mrf.mxu0 }
 0x1b0   : > { %v1536_v26 = vpop.f32.mrf.mxu3  ;;  %v2041_v9 = vpop.f32.mrf.mxu1 }
 0x1b1   : > { %v1554_v31 = vadd.f32 %v1536_v26, %v1400_v5  ;;  %v2080_v46 = vadd.f32 %v2041_v9, %v4370_v6 }
 0x1b3   : > { %v4586_v16 = vadd.f32 %v1870_v39, %v1554_v31 }
 0x1b4   : > { %v2193_v23 = vpop.f32.mrf.mxu2 }
 0x1b5   : > { %v2233_v18 = vadd.f32 %v2193_v23, %v2079_v35 }
 0x1b6   : > { %v2733_v45 = vpop.f32.mrf.mxu0 }
 0x1b8   : > { %v2527_v56 = vpop.f32.mrf.mxu3  ;;  %v2044_v61 = vpop.f32.mrf.mxu1 }
 0x1b9   : > { %v2567_v12 = vadd.f32 %v2527_v56, %v2233_v18  ;;  %v2081_v6 = vadd.f32 %v2044_v61, %v4390_v19 }
 0x1bb   : > { %v2773_v33 = vadd.f32 %v2733_v45, %v2567_v12 }
 0x1bc   : > { %v2195_v13 = vpop.f32.mrf.mxu2 }
 0x1bd   : > { %v2793_v7 = vadd.f32 %v4591_v10, %v2773_v33  ;;  %v2234_v8 = vadd.f32 %v2195_v13, %v2080_v46 }
 0x1be   : > { %v2735_v20 = vpop.f32.mrf.mxu0 }
 0x1bf   : > { %2809 = vst.msk [vmem:[%s4597_s29] sm:$0xff] %vm1006_vm11, %v2793_v7 }
 0x1c0   : > { %v2529_v24 = vpop.f32.mrf.mxu3  ;;  %v2046_v30 = vpop.f32.mrf.mxu1 }
 0x1c1   : > { %v2568_v34 = vadd.f32 %v2529_v24, %v2234_v8  ;;  %v2082_v29 = vadd.f32 %v2046_v30, %v4411_v2 }
 0x1c3   : > { %v2774_v53 = vadd.f32 %v2735_v20, %v2568_v34 }
 0x1c4   : > { %v2198_v28 = vpop.f32.mrf.mxu2 }
 0x1c5   : > { %v2794_v52 = vadd.f32 %v4591_v10, %v2774_v53  ;;  %v2235_v47 = vadd.f32 %v2198_v28, %v2081_v6 }
 0x1c6   : > { %v2738_v50 = vpop.f32.mrf.mxu0 }
 0x1c7   : > { %2810 = vst.msk [vmem:[%s4597_s29 + $0x8] sm:$0xff] %vm1006_vm11, %v2794_v52 }
 0x1c8   : > { %v2532_v17 = vpop.f32.mrf.mxu3  ;;  %v2049_v43 = vpop.f32.mrf.mxu1 }
 0x1c9   : > { %v2569_v58 = vadd.f32 %v2532_v17, %v2235_v47  ;;  %v2083_v55 = vadd.f32 %v2049_v43, %v4429_v22 }
 0x1cb   : > { %v2775_v27 = vadd.f32 %v2738_v50, %v2569_v58 }
 0x1cc   : > { %v2200_v44 = vpop.f32.mrf.mxu2 }
 0x1cd   : > { %v2795_v37 = vadd.f32 %v4591_v10, %v2775_v27  ;;  %v2236_v63 = vadd.f32 %v2200_v44, %v2082_v29 }
 0x1ce   : > { %v2740_v60 = vpop.f32.mrf.mxu0 }
 0x1cf   : > { %2811 = vst.msk [vmem:[%s4597_s29 + $0x10] sm:$0xff] %vm1006_vm11, %v2795_v37 }
 0x1d0   : > { %v2534_v19 = vpop.f32.mrf.mxu3  ;;  %v2051_v11 = vpop.f32.mrf.mxu1 }
 0x1d1   : > { %v2570_v14 = vadd.f32 %v2534_v19, %v2236_v63  ;;  %v2084_v59 = vadd.f32 %v2051_v11, %v4452_v38 }
 0x1d3   : > { %v2776_v4 = vadd.f32 %v2740_v60, %v2570_v14 }
 0x1d4   : > { %v2203_v40 = vpop.f32.mrf.mxu2 }
 0x1d5   : > { %v2796_v54 = vadd.f32 %v4591_v10, %v2776_v4  ;;  %v2237_v21 = vadd.f32 %v2203_v40, %v2083_v55 }
 0x1d6   : > { %v2743_v25 = vpop.f32.mrf.mxu0 }
 0x1d7   : > { %2812 = vst.msk [vmem:[%s4597_s29 + $0x18] sm:$0xff] %vm1006_vm11, %v2796_v54 }
 0x1d8   : > { %v2537_v2 = vpop.f32.mrf.mxu3  ;;  %v2054_v48 = vpop.f32.mrf.mxu1 }
 0x1d9   : > { %v2571_v3 = vadd.f32 %v2537_v2, %v2237_v21  ;;  %v2085_v23 = vadd.f32 %v2054_v48, %v4466_v32 }
 0x1db   : > { %v2777_v36 = vadd.f32 %v2743_v25, %v2571_v3 }
 0x1dc   : > { %v2205_v15 = vpop.f32.mrf.mxu2 }
 0x1dd   : > { %v2797_v5 = vadd.f32 %v4591_v10, %v2777_v36  ;;  %v2238_v39 = vadd.f32 %v2205_v15, %v2084_v59 }
 0x1de   : > { %v2745_v26 = vpop.f32.mrf.mxu0 }
 0x1df   : > { %2813 = vst.msk [vmem:[%s4597_s29 + $0x20] sm:$0xff] %vm1006_vm11, %v2797_v5 }
 0x1e0   : > { %v2539_v22 = vpop.f32.mrf.mxu3  ;;  %v2056_v9 = vpop.f32.mrf.mxu1 }
 0x1e1   : > { %v2572_v31 = vadd.f32 %v2539_v22, %v2238_v39  ;;  %v2086_v13 = vadd.f32 %v2056_v9, %v4488_v49 }
 0x1e3   : > { %v2778_v35 = vadd.f32 %v2745_v26, %v2572_v31 }
 0x1e4   : > { %v2208_v18 = vpop.f32.mrf.mxu2 }
 0x1e5   : > { %v2798_v45 = vadd.f32 %v4591_v10, %v2778_v35  ;;  %v2239_v56 = vadd.f32 %v2208_v18, %v2085_v23 }
 0x1e6   : > { %v2748_v61 = vpop.f32.mrf.mxu0 }
 0x1e7   : > { %2814 = vst.msk [vmem:[%s4597_s29 + $0x28] sm:$0xff] %vm1006_vm11, %v2798_v45 }
 0x1e8   : > { %v2542_v38 = vpop.f32.mrf.mxu3  ;;  %v2059_v12 = vpop.f32.mrf.mxu1 }
 0x1e9   : > { %v2573_v33 = vadd.f32 %v2542_v38, %v2239_v56  ;;  %v2087_v6 = vadd.f32 %v2059_v12, %v4508_v51 }
 0x1eb   : > { %v2779_v46 = vadd.f32 %v2748_v61, %v2573_v33 }
 0x1ec   : > { %v2210_v7 = vpop.f32.mrf.mxu2 }
 0x1ed   : > { %v2799_v8 = vadd.f32 %v4591_v10, %v2779_v46  ;;  %v2240_v20 = vadd.f32 %v2210_v7, %v2086_v13 }
 0x1ee   : > { %v2750_v24 = vpop.f32.mrf.mxu0 }
 0x1ef   : > { %2815 = vst.msk [vmem:[%s4597_s29 + $0x30] sm:$0xff] %vm1006_vm11, %v2799_v8 }
 0x1f0   : > { %v2544_v32 = vpop.f32.mrf.mxu3  ;;  %v2061_v30 = vpop.f32.mrf.mxu1 }
 0x1f1   : > { %v2574_v34 = vadd.f32 %v2544_v32, %v2240_v20  ;;  %v2088_v27 = vadd.f32 %v2061_v30, %v4522_v42 }
 0x1f3   : > { %v2780_v53 = vadd.f32 %v2750_v24, %v2574_v34 }
 0x1f4   : > { %v2213_v28 = vpop.f32.mrf.mxu2 }
 0x1f5   : > { %v2800_v52 = vadd.f32 %v4591_v10, %v2780_v53  ;;  %v2241_v47 = vadd.f32 %v2213_v28, %v2087_v6 }
 0x1f6   : > { %v2753_v50 = vpop.f32.mrf.mxu0 }
 0x1f7   : > { %2816 = vst.msk [vmem:[%s4597_s29 + $0x38] sm:$0xff] %vm1006_vm11, %v2800_v52 }
 0x1f8   : > { %v2547_v49 = vpop.f32.mrf.mxu3  ;;  %v2064_v17 = vpop.f32.mrf.mxu1 }
 0x1f9   : > { %v2575_v43 = vadd.f32 %v2547_v49, %v2241_v47  ;;  %v2089_v14 = vadd.f32 %v2064_v17, %v4541_v57 }
 0x1fb   : > { %v2781_v58 = vadd.f32 %v2753_v50, %v2575_v43 }
 0x1fc   : > { %v2215_v29 = vpop.f32.mrf.mxu2 }
 0x1fd   : > { %v2801_v44 = vadd.f32 %v4591_v10, %v2781_v58  ;;  %v2242_v37 = vadd.f32 %v2215_v29, %v2088_v27 }
 0x1fe   : > { %v2755_v63 = vpop.f32.mrf.mxu0 }
 0x1ff   : > { %2817 = vst.msk [vmem:[%s4597_s29 + $0x40] sm:$0xff] %vm1006_vm11, %v2801_v44 }
 0x200   : > { %v2549_v51 = vpop.f32.mrf.mxu3  ;;  %v2066_v60 = vpop.f32.mrf.mxu1 }
 0x201   : > { %v2576_v19 = vadd.f32 %v2549_v51, %v2242_v37  ;;  %v2090_v48 = vadd.f32 %v2066_v60, %v4555_v41 }
 0x203   : > { %v2782_v11 = vadd.f32 %v2755_v63, %v2576_v19 }
 0x204   : > { %v2218_v4 = vpop.f32.mrf.mxu2 }
 0x205   : > { %v2802_v55 = vadd.f32 %v4591_v10, %v2782_v11  ;;  %v2243_v40 = vadd.f32 %v2218_v4, %v2089_v14 }
 0x206   : > { %v2758_v54 = vpop.f32.mrf.mxu0 }
 0x207   : > { %2818 = vst.msk [vmem:[%s4597_s29 + $0x48] sm:$0xff] %vm1006_vm11, %v2802_v55 }
 0x208   : > { %v2552_v42 = vpop.f32.mrf.mxu3  ;;  %v2069_v25 = vpop.f32.mrf.mxu1 }
 0x209   : > { %v2577_v21 = vadd.f32 %v2552_v42, %v2243_v40  ;;  %v2091_v26 = vadd.f32 %v2069_v25, %v4567_v0 }
 0x20b   : > { %v2783_v2 = vadd.f32 %v2758_v54, %v2577_v21 }
 0x20c   : > { %v2220_v3 = vpop.f32.mrf.mxu2 }
 0x20d   : > { %v2803_v36 = vadd.f32 %v4591_v10, %v2783_v2  ;;  %v2244_v59 = vadd.f32 %v2220_v3, %v2090_v48 }
 0x20e   : > { %v2760_v15 = vpop.f32.mrf.mxu0 }
 0x20f   : > { %2819 = vst.msk [vmem:[%s4597_s29 + $0x50] sm:$0xff] %vm1006_vm11, %v2803_v36 }
 0x210   : > { %v2554_v57 = vpop.f32.mrf.mxu3  ;;  %v2071_v22 = vpop.f32.mrf.mxu1 }
 0x211   : > { %v2578_v5 = vadd.f32 %v2554_v57, %v2244_v59  ;;  %v2092_v56 = vadd.f32 %v2071_v22, %v4576_v1 }
 0x213   : > { %v2784_v39 = vadd.f32 %v2760_v15, %v2578_v5 }
 0x214   : > { %v2223_v9 = vpop.f32.mrf.mxu2 }
 0x215   : > { %v2804_v31 = vadd.f32 %v4591_v10, %v2784_v39  ;;  %v2245_v35 = vadd.f32 %v2223_v9, %v2091_v26 }
 0x216   : > { %v2763_v23 = vpop.f32.mrf.mxu0 }
 0x217   : > { %2820 = vst.msk [vmem:[%s4597_s29 + $0x58] sm:$0xff] %vm1006_vm11, %v2804_v31 }
 0x218   : > { %v2557_v41 = vpop.f32.mrf.mxu3  ;;  %v2074_v0 = vpop.f32.mrf.mxu1 }
 0x219   : > { %v2579_v18 = vadd.f32 %v2557_v41, %v2245_v35  ;;  %v2093_v8 = vadd.f32 %v2074_v0, %v4582_v62 }
 0x21b   : > { %v2785_v45 = vadd.f32 %v2763_v23, %v2579_v18 }
 0x21c   : > { %v2225_v61 = vpop.f32.mrf.mxu2 }
 0x21d   : > { %v2805_v38 = vadd.f32 %v4591_v10, %v2785_v45  ;;  %v2246_v12 = vadd.f32 %v2225_v61, %v2092_v56 }
 0x21e   : > { %v2765_v33 = vpop.f32.mrf.mxu0 }
 0x21f   : > { %2821 = vst.msk [vmem:[%s4597_s29 + $0x60] sm:$0xff] %vm1006_vm11, %v2805_v38 }
 0x220   : > { %v2559_v46 = vpop.f32.mrf.mxu3  ;;  %v2076_v1 = vpop.f32.mrf.mxu1 }
 0x221   : > { %v2580_v13 = vadd.f32 %v2559_v46, %v2246_v12  ;;  %v2094_v28 = vadd.f32 %v2076_v1, %v4586_v16 }
 0x223   : > { %v2786_v7 = vadd.f32 %v2765_v33, %v2580_v13 }
 0x224   : > { %v2228_v20 = vpop.f32.mrf.mxu2 }
 0x225   : > { %v2806_v24 = vadd.f32 %v4591_v10, %v2786_v7  ;;  %v2247_v32 = vadd.f32 %v2228_v20, %v2093_v8 }
 0x226   : > { %v2768_v30 = vpop.f32.mrf.mxu0 }
 0x227   : > { %2822 = vst.msk [vmem:[%s4597_s29 + $0x68] sm:$0xff] %vm1006_vm11, %v2806_v24 }
 0x228   : > { %v2562_v34 = vpop.f32.mrf.mxu3 }
 0x229   : > { %v2581_v53 = vadd.f32 %v2562_v34, %v2247_v32 }
 0x22b   : > { %v2787_v6 = vadd.f32 %v2768_v30, %v2581_v53 }
 0x22c   : > { %v2230_v52 = vpop.f32.mrf.mxu2 }
 0x22d   : > { %v2807_v47 = vadd.f32 %v4591_v10, %v2787_v6  ;;  %v2248_v50 = vadd.f32 %v2230_v52, %v2094_v28 }
 0x22e   : > { %v2770_v17 = vpop.f32.mrf.mxu0 }
 0x22f   : > { %2823 = vst.msk [vmem:[%s4597_s29 + $0x70] sm:$0xff] %vm1006_vm11, %v2807_v47 }
 0x230   : > { %v2564_v62 = vpop.f32.mrf.mxu3 }
 0x231   : > { %v2582_v49 = vadd.f32 %v2564_v62, %v2248_v50 }
 0x233   : > { %v2788_v43 = vadd.f32 %v2770_v17, %v2582_v49 }
 0x235   : > { %v2808_v58 = vadd.f32 %v4591_v10, %v2788_v43 }
 0x237   : > { %2824 = vst.msk [vmem:[%s4597_s29 + $0x78] sm:$0xff] %vm1006_vm11, %v2808_v58 }
 0x238 PF: > { %s13_s16 = sadd.s32 1, %s3343_s16   ;;  %s4690_s12 = smov %s3335_s14 }
 0x239   : > { %p10_p7 = scmp.ge.s32.totalorder %s13_s16, 6   ;;  %s4691_s13 = smov %s3339_s15 }
 0x23a   : > { %s4692_s14 = smov %s4695_s17  ;;  %s4693_s15 = smov %s4699_s18 }
 0x23b   :  { %12 = sbr.rel (!%p10_p7) target bundleno = 3 (0x3), region = 74 }

</bundles_post_ra>
